<compile_context>
chip_gen: v7x
topology: tpu7x:2x2x1
jax: 0.10.0
libtpu: 0.0.40
codegen_flags: <defaults>
</compile_context>

<pallas_src>
import math
import functools

import jax
import jax.numpy as jnp
from jax.experimental import pallas as pl
from jax.experimental.pallas import tpu as pltpu


def _round_up(x, m):
    return ((x + m - 1) // m) * m


# ----------------------------------------------------------------------------
# Fused forward kernel (gridless; whole arrays resident in VMEM)
# ----------------------------------------------------------------------------
def _fused_forward_kernel(data_ref, w_ref, o_ref, act_ref, *, cfg):
    f32 = jnp.float32
    latent, con, tdim = cfg["latent"], cfg["con"], cfg["time"]
    n_feat, half, cat = cfg["n_feat"], cfg["half"], cfg["cat"]

    def dot(a, b):
        return jnp.dot(a, b, preferred_element_type=f32,
                       precision=jax.lax.Precision.HIGHEST)

    # ---- unpack the single per-batch data slab -----------------------------
    x_in     = data_ref[:, 0:n_feat]
    true_z   = data_ref[:, cfg["o_z"]:cfg["o_z"] + latent]
    noises   = data_ref[:, cfg["o_n"]:cfg["o_n"] + latent]
    sqrt_a   = data_ref[:, cfg["o_s"]    :cfg["o_s"] + 1]
    sqrt_1ma = data_ref[:, cfg["o_s"] + 1:cfg["o_s"] + 2]
    t        = data_ref[:, cfg["o_s"] + 2:cfg["o_s"] + 3]

    # ---- condition model (single-Linear embedding stub) --------------------
    # TODO(synk): real condition_model is hydra-instantiated (external); a
    #             deterministic single Linear embedding stub is used here.
    rcw, rcb = cfg["r_cond_w"], cfg["r_cond_b"]
    cond = w_ref[rcb:rcb + 1, 0:con] + dot(x_in, w_ref[rcw:rcw + n_feat, 0:con])

    # ---- sinusoidal time embedding fused with time_mlp ----------------------
    # cat(sin, cos) @ W == sin @ W[:half] + cos @ W[half:]   (no lane concat).
    # freqs are a trace-time constant (max(half-1,1) guards the half==1
    # divide-by-zero in the PyTorch formula).
    idx = jax.lax.broadcasted_iota(jnp.int32, (1, half), 1).astype(f32)
    freqs = jnp.exp(idx * (-cfg["scale"]))
    arg = t * freqs                                          # [B, half]
    rtw, rtb = cfg["r_tmlp_w"], cfg["r_tmlp_b"]
    temb = (w_ref[rtb:rtb + 1, 0:tdim]
            + dot(jnp.sin(arg), w_ref[rtw:rtw + half, 0:tdim])
            + dot(jnp.cos(arg), w_ref[rtw + half:rtw + tdim, 0:tdim]))
    temb = jnp.maximum(temb, 0.0)

    # ---- DDPM noisy-z mix (per-row scalars broadcast over lanes) -----------
    noisy_z = sqrt_a * true_z + sqrt_1ma * noises

    # ---- activation slab: [x | cond | temb | 1 | 0-pad] --------------------
    # cond / temb / ones lanes are loop-invariant; every layer only rewrites
    # the x lanes.  Stale x lanes beyond a layer's input width are multiplied
    # by zero weight rows, so no per-layer zeroing is needed.
    act_ref[...] = jnp.zeros(act_ref.shape, f32)
    act_ref[:, latent:latent + con] = cond
    act_ref[:, latent + con:cat] = temb
    act_ref[:, cat:cat + 1] = jnp.ones((act_ref.shape[0], 1), f32)
    act_ref[:, 0:latent] = noisy_z

    def layer(i, relu):
        r, out = cfg["unet_rows"][i], cfg["unet_out"][i]
        y = dot(act_ref[...], w_ref[r:r + cfg["k_aug"], 0:out])
        return jnp.maximum(y, 0.0) if relu else y

    nl = cfg["n_lay"]
    skips = []
    for i in range(nl):                              # down path
        y = layer(i, True)
        skips.append(y)
        act_ref[:, 0:y.shape[1]] = y
    y = layer(nl, True)                              # middle
    for j, skip in enumerate(reversed(skips)):       # up path (+ skip adds)
        x = y + skip
        act_ref[:, 0:x.shape[1]] = x
        y = layer(nl + 1 + j, True)
    x = y + noisy_z                                  # + latent residual
    act_ref[:, 0:latent] = x
    o_ref[...] = layer(2 * nl + 1, False)            # output_mlp (no ReLU)


def fused_condition_diff_z(params, x_in, true_z, noises, sqrt_a, sqrt_1ma, t_f32):
    """Single gridless pallas_call for the whole forward. Returns pre_diff_z."""
    cfg = params["cfg"]
    B, latent = true_z.shape

    data = jnp.concatenate(
        [x_in.astype(jnp.float32),
         true_z.astype(jnp.float32),
         noises.astype(jnp.float32),
         sqrt_a[:, None].astype(jnp.float32),
         sqrt_1ma[:, None].astype(jnp.float32),
         t_f32[:, None].astype(jnp.float32)], axis=-1)
    assert data.shape[1] == cfg["data_width"]

    kernel = functools.partial(_fused_forward_kernel, cfg=cfg)
    return pl.pallas_call(
        kernel,
        out_shape=jax.ShapeDtypeStruct((B, latent), jnp.float32),
        in_specs=[pl.BlockSpec(memory_space=pltpu.MemorySpace.VMEM),
                  pl.BlockSpec(memory_space=pltpu.MemorySpace.VMEM)],
        out_specs=pl.BlockSpec(memory_space=pltpu.MemorySpace.VMEM),
        scratch_shapes=[pltpu.VMEM((B, cfg["k_aug"]), jnp.float32)],
    )(data, params["wslab"])


# ----------------------------------------------------------------------------
# Parameter construction (PyTorch nn.Linear-style init) + slab packing
# ----------------------------------------------------------------------------
def init_linear(key, fan_in, fan_out):
    kw, kb = jax.random.split(key)
    bound = 1.0 / math.sqrt(fan_in)
    w = jax.random.uniform(kw, (fan_in, fan_out), jnp.float32, -bound, bound)
    b = jax.random.uniform(kb, (1, fan_out), jnp.float32, -bound, bound)
    return w, b


def build_params(key, latent_dim, con_dim, time_dim, n_unet_lay, n_in_features):
    keys = jax.random.split(key, 4 + 2 * n_unet_lay)
    ki = iter(keys)

    cond_w, cond_b = init_linear(next(ki), n_in_features, con_dim)
    tmlp_w, tmlp_b = init_linear(next(ki), time_dim, time_dim)

    # UNet layers in forward order: down_0..down_{L-1}, middle, upmodel, output.
    down, up = [], []
    now = latent_dim
    out = now
    for _ in range(n_unet_lay):
        assert now / 2 > 2
        out = now // 2
        down.append((now,) + init_linear(next(ki), now + con_dim + time_dim, out))
        up.append((out,) + init_linear(next(ki), out + con_dim + time_dim, now))
        now = out
    up = up[::-1]                                   # nn.ModuleList(up_list[::-1])
    middle = (now,) + init_linear(next(ki), now + con_dim + time_dim, out)
    output = (latent_dim,) + init_linear(next(ki),
                                         latent_dim + con_dim + time_dim, latent_dim)
    unet = down + [middle] + up + [output]          # (x_dim, w, b) per layer

    # ---- pack EVERYTHING into one (rows, c_max) weight slab -----------------
    cat = latent_dim + con_dim + time_dim
    k_aug = _round_up(cat + 1, 8)                   # +1 ones-lane for bias
    c_max = max(latent_dim, con_dim, time_dim)

    r_cond_w = 0
    r_cond_b = _round_up(n_in_features, 8)
    r_tmlp_w = _round_up(r_cond_b + 1, 8)
    r_tmlp_b = _round_up(r_tmlp_w + time_dim, 8)
    r0 = _round_up(r_tmlp_b + 1, 8)
    unet_rows = tuple(r0 + i * k_aug for i in range(len(unet)))
    n_rows = unet_rows[-1] + k_aug

    slab = jnp.zeros((n_rows, c_max), jnp.float32)
    slab = slab.at[r_cond_w:r_cond_w + n_in_features, 0:con_dim].set(cond_w)
    slab = slab.at[r_cond_b:r_cond_b + 1, 0:con_dim].set(cond_b)
    slab = slab.at[r_tmlp_w:r_tmlp_w + time_dim, 0:time_dim].set(tmlp_w)
    slab = slab.at[r_tmlp_b:r_tmlp_b + 1, 0:time_dim].set(tmlp_b)

    unet_out = []
    for i, (x_dim, w, b) in enumerate(unet):
        o = w.shape[1]
        unet_out.append(o)
        r = unet_rows[i]
        # concat order [x, condition, time_emb] preserved at fixed lane offsets;
        # rows [x_dim:latent) and [cat+1:k_aug) stay ZERO to mask stale x lanes.
        slab = slab.at[r:r + x_dim, 0:o].set(w[0:x_dim])
        slab = slab.at[r + latent_dim:r + latent_dim + con_dim, 0:o].set(
            w[x_dim:x_dim + con_dim])
        slab = slab.at[r + latent_dim + con_dim:r + cat, 0:o].set(
            w[x_dim + con_dim:])
        slab = slab.at[r + cat:r + cat + 1, 0:o].set(b)   # bias on the ones-lane row

    half = time_dim // 2
    scale = math.log(10000.0) / max(half - 1, 1)    # guard half==1 div-by-zero

    cfg = dict(
        latent=latent_dim, con=con_dim, time=time_dim, n_feat=n_in_features,
        half=half, scale=scale, cat=cat, k_aug=k_aug, n_lay=n_unet_lay,
        r_cond_w=r_cond_w, r_cond_b=r_cond_b, r_tmlp_w=r_tmlp_w, r_tmlp_b=r_tmlp_b,
        unet_rows=unet_rows, unet_out=tuple(unet_out),
        o_z=n_in_features, o_n=n_in_features + latent_dim,
        o_s=n_in_features + 2 * latent_dim,
        data_width=n_in_features + 2 * latent_dim + 3,
    )
    return {"wslab": slab, "cfg": cfg}


def build_schedule(noise_start, noise_end, n_noise):
    betas = jnp.linspace(noise_start, noise_end, n_noise)
    alphas = 1.0 - betas
    alphas_cumprod = jnp.cumprod(alphas, axis=0)
    alphas_cumprod_prev = jnp.concatenate(
        [jnp.ones((1,), betas.dtype), alphas_cumprod[:-1]])
    return {
        "betas": betas,
        "sqrt_recip_alphas": jnp.sqrt(1.0 / alphas),
        "sqrt_alphas_cumprod": jnp.sqrt(alphas_cumprod),
        "sqrt_one_minus_alphas_cumprod": jnp.sqrt(1.0 - alphas_cumprod),
        "posterior_variance": betas * (1.0 - alphas_cumprod_prev)
        / (1.0 - alphas_cumprod),
    }


# ----------------------------------------------------------------------------
# Model forward (mirrors condition_diff_z.forward)
# ----------------------------------------------------------------------------
def condition_diff_z_forward(params, sched, x_in, true_z, rng):
    B = true_z.shape[0]
    k_level, k_noise = jax.random.split(rng)
    n_noise = sched["betas"].shape[0]

    # torch.randint / torch.randn_like -> jax.random (not bit-identical RNG).
    noise_level = jax.random.randint(k_level, (B,), 0, n_noise)
    noises = jax.random.normal(k_noise, true_z.shape, jnp.float32)

    used_sqrt_a = sched["sqrt_alphas_cumprod"][noise_level]
    used_sqrt_1ma = sched["sqrt_one_minus_alphas_cumprod"][noise_level]

    pre_diff_z = fused_condition_diff_z(
        params, x_in.astype(jnp.float32), true_z.astype(jnp.float32), noises,
        used_sqrt_a, used_sqrt_1ma, noise_level.astype(jnp.float32))
    return noises, pre_diff_z


# ----------------------------------------------------------------------------
# Main
# ----------------------------------------------------------------------------
if __name__ == "__main__":
    # Small shapes consistent with the module (cfg.model.hidden_dim, etc.)
    B = 8            # batch (number of crystals / num_atoms.size(0))
    N_FEAT = 24      # raw condition-model input features
    HIDDEN = 32      # cfg.model.hidden_dim == UNet latent_dim
    CON_DIM = 16     # condition embedding dim
    TIME_DIM = 16    # ld_kwargs.time_emb_dim
    N_UNET = 3       # ld_kwargs.n_UNet_lay
    N_NOISE = 10     # ld_kwargs.ddpm_n_noise
    NOISE_START, NOISE_END = 1e-4, 0.02

    root = jax.random.PRNGKey(0)
    k_params, k_x, k_z, k_fwd = jax.random.split(root, 4)

    params = build_params(k_params, HIDDEN, CON_DIM, TIME_DIM, N_UNET, N_FEAT)
    sched = build_schedule(NOISE_START, NOISE_END, N_NOISE)

    x_in = jax.random.normal(k_x, (B, N_FEAT), jnp.float32)
    true_z = jax.random.normal(k_z, (B, HIDDEN), jnp.float32)

    noises, pre_diff_z = condition_diff_z_forward(params, sched, x_in, true_z, k_fwd)
    jax.block_until_ready((noises, pre_diff_z))

    assert noises.shape == (B, HIDDEN)
    assert pre_diff_z.shape == (B, HIDDEN)
    assert bool(jnp.all(jnp.isfinite(pre_diff_z)))
    print("KERNEL_OK")
</pallas_src>

<mosaic_0001>
module attributes {stable_mosaic.version = 11 : i64} {
  func.func @_fused_forward_kernel(%arg0: memref<8x91xf32, #tpu.memory_space<vmem>>, %arg1: memref<632x32xf32, #tpu.memory_space<vmem>>, %arg2: memref<8x32xf32, #tpu.memory_space<vmem>>, %arg3: memref<8x72xf32, #tpu.memory_space<vmem>>) attributes {dimension_semantics = [], scalar_prefetch = 0 : i64, scratch_operands = 1 : i64, tpu.core_type = #tpu.core_type<tc>} {
    %c0 = arith.constant 0 : index
    %c0_0 = arith.constant 0 : index
    %0 = vector.load %arg0[%c0, %c0_0] : memref<8x91xf32, #tpu.memory_space<vmem>>, vector<8x24xf32>
    %c0_1 = arith.constant 0 : index
    %c24 = arith.constant 24 : index
    %1 = vector.load %arg0[%c0_1, %c24] : memref<8x91xf32, #tpu.memory_space<vmem>>, vector<8x32xf32>
    %c0_2 = arith.constant 0 : index
    %c56 = arith.constant 56 : index
    %2 = vector.load %arg0[%c0_2, %c56] : memref<8x91xf32, #tpu.memory_space<vmem>>, vector<8x32xf32>
    %c0_3 = arith.constant 0 : index
    %c88 = arith.constant 88 : index
    %3 = vector.load %arg0[%c0_3, %c88] : memref<8x91xf32, #tpu.memory_space<vmem>>, vector<8x1xf32>
    %c0_4 = arith.constant 0 : index
    %c89 = arith.constant 89 : index
    %4 = vector.load %arg0[%c0_4, %c89] : memref<8x91xf32, #tpu.memory_space<vmem>>, vector<8x1xf32>
    %c0_5 = arith.constant 0 : index
    %c90 = arith.constant 90 : index
    %5 = vector.load %arg0[%c0_5, %c90] : memref<8x91xf32, #tpu.memory_space<vmem>>, vector<8x1xf32>
    %c24_6 = arith.constant 24 : index
    %c0_7 = arith.constant 0 : index
    %6 = vector.load %arg1[%c24_6, %c0_7] : memref<632x32xf32, #tpu.memory_space<vmem>>, vector<1x16xf32>
    %c0_8 = arith.constant 0 : index
    %c0_9 = arith.constant 0 : index
    %7 = vector.load %arg1[%c0_8, %c0_9] : memref<632x32xf32, #tpu.memory_space<vmem>>, vector<24x16xf32>
    %cst = arith.constant dense<0.000000e+00> : vector<8x16xf32>
    %8 = tpu.matmul %0, %7, %cst {dimension_numbers = #tpu.dot_dimension_numbers<[1], [0], [0], [1], [0, 0, 1, 1], [], []>, precision = #tpu.contract_precision<fp32>} : vector<8x24xf32>, vector<24x16xf32>, vector<8x16xf32> -> vector<8x16xf32>
    %9 = vector.broadcast %6 : vector<1x16xf32> to vector<8x16xf32>
    %10 = arith.addf %9, %8 : vector<8x16xf32>
    %11 = tpu.iota {dimensions = array<i32: 1>} : vector<1x8xi32>
    %12 = arith.sitofp %11 : vector<1x8xi32> to vector<1x8xf32>
    %cst_10 = arith.constant -1.31576288 : f32
    %13 = vector.broadcast %cst_10 : f32 to vector<1x8xf32>
    %14 = arith.mulf %12, %13 : vector<1x8xf32>
    %15 = math.exp %14 : vector<1x8xf32>
    %16 = vector.broadcast %5 : vector<8x1xf32> to vector<8x8xf32>
    %17 = vector.broadcast %15 : vector<1x8xf32> to vector<8x8xf32>
    %18 = arith.mulf %16, %17 : vector<8x8xf32>
    %c48 = arith.constant 48 : index
    %c0_11 = arith.constant 0 : index
    %19 = vector.load %arg1[%c48, %c0_11] : memref<632x32xf32, #tpu.memory_space<vmem>>, vector<1x16xf32>
    %20 = math.sin %18 : vector<8x8xf32>
    %c32 = arith.constant 32 : index
    %c0_12 = arith.constant 0 : index
    %21 = vector.load %arg1[%c32, %c0_12] : memref<632x32xf32, #tpu.memory_space<vmem>>, vector<8x16xf32>
    %cst_13 = arith.constant dense<0.000000e+00> : vector<8x16xf32>
    %22 = tpu.matmul %20, %21, %cst_13 {dimension_numbers = #tpu.dot_dimension_numbers<[1], [0], [0], [1], [0, 0, 1, 1], [], []>, precision = #tpu.contract_precision<fp32>} : vector<8x8xf32>, vector<8x16xf32>, vector<8x16xf32> -> vector<8x16xf32>
    %23 = vector.broadcast %19 : vector<1x16xf32> to vector<8x16xf32>
    %24 = arith.addf %23, %22 : vector<8x16xf32>
    %25 = math.cos %18 : vector<8x8xf32>
    %c40 = arith.constant 40 : index
    %c0_14 = arith.constant 0 : index
    %26 = vector.load %arg1[%c40, %c0_14] : memref<632x32xf32, #tpu.memory_space<vmem>>, vector<8x16xf32>
    %cst_15 = arith.constant dense<0.000000e+00> : vector<8x16xf32>
    %27 = tpu.matmul %25, %26, %cst_15 {dimension_numbers = #tpu.dot_dimension_numbers<[1], [0], [0], [1], [0, 0, 1, 1], [], []>, precision = #tpu.contract_precision<fp32>} : vector<8x8xf32>, vector<8x16xf32>, vector<8x16xf32> -> vector<8x16xf32>
    %28 = arith.addf %24, %27 : vector<8x16xf32>
    %cst_16 = arith.constant 0.000000e+00 : f32
    %29 = vector.broadcast %cst_16 : f32 to vector<8x16xf32>
    %30 = arith.maximumf %28, %29 : vector<8x16xf32>
    %31 = vector.broadcast %3 : vector<8x1xf32> to vector<8x32xf32>
    %32 = arith.mulf %31, %1 : vector<8x32xf32>
    %33 = vector.broadcast %4 : vector<8x1xf32> to vector<8x32xf32>
    %34 = arith.mulf %33, %2 : vector<8x32xf32>
    %35 = arith.addf %32, %34 : vector<8x32xf32>
    %cst_17 = arith.constant 0.000000e+00 : f32
    %36 = vector.broadcast %cst_17 : f32 to vector<8x72xf32>
    %c0_18 = arith.constant 0 : index
    %c0_19 = arith.constant 0 : index
    %37 = vector.load %arg3[%c0_18, %c0_19] : memref<8x72xf32, #tpu.memory_space<vmem>>, vector<8x72xf32>
    tpu.vector_store %arg3[%c0_18, %c0_19], %36 {strides = array<i32>} : memref<8x72xf32, #tpu.memory_space<vmem>>, vector<8x72xf32>,
    %c0_20 = arith.constant 0 : index
    %c32_21 = arith.constant 32 : index
    %38 = vector.load %arg3[%c0_20, %c32_21] : memref<8x72xf32, #tpu.memory_space<vmem>>, vector<8x16xf32>
    tpu.vector_store %arg3[%c0_20, %c32_21], %10 {strides = array<i32>} : memref<8x72xf32, #tpu.memory_space<vmem>>, vector<8x16xf32>,
    %c0_22 = arith.constant 0 : index
    %c48_23 = arith.constant 48 : index
    %39 = vector.load %arg3[%c0_22, %c48_23] : memref<8x72xf32, #tpu.memory_space<vmem>>, vector<8x16xf32>
    tpu.vector_store %arg3[%c0_22, %c48_23], %30 {strides = array<i32>} : memref<8x72xf32, #tpu.memory_space<vmem>>, vector<8x16xf32>,
    %cst_24 = arith.constant 1.000000e+00 : f32
    %40 = vector.broadcast %cst_24 : f32 to vector<8x1xf32>
    %c0_25 = arith.constant 0 : index
    %c64 = arith.constant 64 : index
    %41 = vector.load %arg3[%c0_25, %c64] : memref<8x72xf32, #tpu.memory_space<vmem>>, vector<8x1xf32>
    tpu.vector_store %arg3[%c0_25, %c64], %40 {strides = array<i32>} : memref<8x72xf32, #tpu.memory_space<vmem>>, vector<8x1xf32>,
    %c0_26 = arith.constant 0 : index
    %c0_27 = arith.constant 0 : index
    %42 = vector.load %arg3[%c0_26, %c0_27] : memref<8x72xf32, #tpu.memory_space<vmem>>, vector<8x32xf32>
    tpu.vector_store %arg3[%c0_26, %c0_27], %35 {strides = array<i32>} : memref<8x72xf32, #tpu.memory_space<vmem>>, vector<8x32xf32>,
    %c0_28 = arith.constant 0 : index
    %c0_29 = arith.constant 0 : index
    %43 = vector.load %arg3[%c0_28, %c0_29] : memref<8x72xf32, #tpu.memory_space<vmem>>, vector<8x72xf32>
    %c56_30 = arith.constant 56 : index
    %c0_31 = arith.constant 0 : index
    %44 = vector.load %arg1[%c56_30, %c0_31] : memref<632x32xf32, #tpu.memory_space<vmem>>, vector<72x16xf32>
    %cst_32 = arith.constant dense<0.000000e+00> : vector<8x16xf32>
    %45 = tpu.matmul %43, %44, %cst_32 {dimension_numbers = #tpu.dot_dimension_numbers<[1], [0], [0], [1], [0, 0, 1, 1], [], []>, precision = #tpu.contract_precision<fp32>} : vector<8x72xf32>, vector<72x16xf32>, vector<8x16xf32> -> vector<8x16xf32>
    %cst_33 = arith.constant 0.000000e+00 : f32
    %46 = vector.broadcast %cst_33 : f32 to vector<8x16xf32>
    %47 = arith.maximumf %45, %46 : vector<8x16xf32>
    %c0_34 = arith.constant 0 : index
    %c0_35 = arith.constant 0 : index
    %48 = vector.load %arg3[%c0_34, %c0_35] : memref<8x72xf32, #tpu.memory_space<vmem>>, vector<8x16xf32>
    tpu.vector_store %arg3[%c0_34, %c0_35], %47 {strides = array<i32>} : memref<8x72xf32, #tpu.memory_space<vmem>>, vector<8x16xf32>,
    %c0_36 = arith.constant 0 : index
    %c0_37 = arith.constant 0 : index
    %49 = vector.load %arg3[%c0_36, %c0_37] : memref<8x72xf32, #tpu.memory_space<vmem>>, vector<8x72xf32>
    %c128 = arith.constant 128 : index
    %c0_38 = arith.constant 0 : index
    %50 = vector.load %arg1[%c128, %c0_38] : memref<632x32xf32, #tpu.memory_space<vmem>>, vector<72x8xf32>
    %cst_39 = arith.constant dense<0.000000e+00> : vector<8x8xf32>
    %51 = tpu.matmul %49, %50, %cst_39 {dimension_numbers = #tpu.dot_dimension_numbers<[1], [0], [0], [1], [0, 0, 1, 1], [], []>, precision = #tpu.contract_precision<fp32>} : vector<8x72xf32>, vector<72x8xf32>, vector<8x8xf32> -> vector<8x8xf32>
    %cst_40 = arith.constant 0.000000e+00 : f32
    %52 = vector.broadcast %cst_40 : f32 to vector<8x8xf32>
    %53 = arith.maximumf %51, %52 : vector<8x8xf32>
    %c0_41 = arith.constant 0 : index
    %c0_42 = arith.constant 0 : index
    %54 = vector.load %arg3[%c0_41, %c0_42] : memref<8x72xf32, #tpu.memory_space<vmem>>, vector<8x8xf32>
    tpu.vector_store %arg3[%c0_41, %c0_42], %53 {strides = array<i32>} : memref<8x72xf32, #tpu.memory_space<vmem>>, vector<8x8xf32>,
    %c0_43 = arith.constant 0 : index
    %c0_44 = arith.constant 0 : index
    %55 = vector.load %arg3[%c0_43, %c0_44] : memref<8x72xf32, #tpu.memory_space<vmem>>, vector<8x72xf32>
    %c200 = arith.constant 200 : index
    %c0_45 = arith.constant 0 : index
    %56 = vector.load %arg1[%c200, %c0_45] : memref<632x32xf32, #tpu.memory_space<vmem>>, vector<72x4xf32>
    %cst_46 = arith.constant dense<0.000000e+00> : vector<8x4xf32>
    %57 = tpu.matmul %55, %56, %cst_46 {dimension_numbers = #tpu.dot_dimension_numbers<[1], [0], [0], [1], [0, 0, 1, 1], [], []>, precision = #tpu.contract_precision<fp32>} : vector<8x72xf32>, vector<72x4xf32>, vector<8x4xf32> -> vector<8x4xf32>
    %cst_47 = arith.constant 0.000000e+00 : f32
    %58 = vector.broadcast %cst_47 : f32 to vector<8x4xf32>
    %59 = arith.maximumf %57, %58 : vector<8x4xf32>
    %c0_48 = arith.constant 0 : index
    %c0_49 = arith.constant 0 : index
    %60 = vector.load %arg3[%c0_48, %c0_49] : memref<8x72xf32, #tpu.memory_space<vmem>>, vector<8x4xf32>
    tpu.vector_store %arg3[%c0_48, %c0_49], %59 {strides = array<i32>} : memref<8x72xf32, #tpu.memory_space<vmem>>, vector<8x4xf32>,
    %c0_50 = arith.constant 0 : index
    %c0_51 = arith.constant 0 : index
    %61 = vector.load %arg3[%c0_50, %c0_51] : memref<8x72xf32, #tpu.memory_space<vmem>>, vector<8x72xf32>
    %c272 = arith.constant 272 : index
    %c0_52 = arith.constant 0 : index
    %62 = vector.load %arg1[%c272, %c0_52] : memref<632x32xf32, #tpu.memory_space<vmem>>, vector<72x4xf32>
    %cst_53 = arith.constant dense<0.000000e+00> : vector<8x4xf32>
    %63 = tpu.matmul %61, %62, %cst_53 {dimension_numbers = #tpu.dot_dimension_numbers<[1], [0], [0], [1], [0, 0, 1, 1], [], []>, precision = #tpu.contract_precision<fp32>} : vector<8x72xf32>, vector<72x4xf32>, vector<8x4xf32> -> vector<8x4xf32>
    %cst_54 = arith.constant 0.000000e+00 : f32
    %64 = vector.broadcast %cst_54 : f32 to vector<8x4xf32>
    %65 = arith.maximumf %63, %64 : vector<8x4xf32>
    %66 = arith.addf %65, %59 : vector<8x4xf32>
    %c0_55 = arith.constant 0 : index
    %c0_56 = arith.constant 0 : index
    %67 = vector.load %arg3[%c0_55, %c0_56] : memref<8x72xf32, #tpu.memory_space<vmem>>, vector<8x4xf32>
    tpu.vector_store %arg3[%c0_55, %c0_56], %66 {strides = array<i32>} : memref<8x72xf32, #tpu.memory_space<vmem>>, vector<8x4xf32>,
    %c0_57 = arith.constant 0 : index
    %c0_58 = arith.constant 0 : index
    %68 = vector.load %arg3[%c0_57, %c0_58] : memref<8x72xf32, #tpu.memory_space<vmem>>, vector<8x72xf32>
    %c344 = arith.constant 344 : index
    %c0_59 = arith.constant 0 : index
    %69 = vector.load %arg1[%c344, %c0_59] : memref<632x32xf32, #tpu.memory_space<vmem>>, vector<72x8xf32>
    %cst_60 = arith.constant dense<0.000000e+00> : vector<8x8xf32>
    %70 = tpu.matmul %68, %69, %cst_60 {dimension_numbers = #tpu.dot_dimension_numbers<[1], [0], [0], [1], [0, 0, 1, 1], [], []>, precision = #tpu.contract_precision<fp32>} : vector<8x72xf32>, vector<72x8xf32>, vector<8x8xf32> -> vector<8x8xf32>
    %cst_61 = arith.constant 0.000000e+00 : f32
    %71 = vector.broadcast %cst_61 : f32 to vector<8x8xf32>
    %72 = arith.maximumf %70, %71 : vector<8x8xf32>
    %73 = arith.addf %72, %53 : vector<8x8xf32>
    %c0_62 = arith.constant 0 : index
    %c0_63 = arith.constant 0 : index
    %74 = vector.load %arg3[%c0_62, %c0_63] : memref<8x72xf32, #tpu.memory_space<vmem>>, vector<8x8xf32>
    tpu.vector_store %arg3[%c0_62, %c0_63], %73 {strides = array<i32>} : memref<8x72xf32, #tpu.memory_space<vmem>>, vector<8x8xf32>,
    %c0_64 = arith.constant 0 : index
    %c0_65 = arith.constant 0 : index
    %75 = vector.load %arg3[%c0_64, %c0_65] : memref<8x72xf32, #tpu.memory_space<vmem>>, vector<8x72xf32>
    %c416 = arith.constant 416 : index
    %c0_66 = arith.constant 0 : index
    %76 = vector.load %arg1[%c416, %c0_66] : memref<632x32xf32, #tpu.memory_space<vmem>>, vector<72x16xf32>
    %cst_67 = arith.constant dense<0.000000e+00> : vector<8x16xf32>
    %77 = tpu.matmul %75, %76, %cst_67 {dimension_numbers = #tpu.dot_dimension_numbers<[1], [0], [0], [1], [0, 0, 1, 1], [], []>, precision = #tpu.contract_precision<fp32>} : vector<8x72xf32>, vector<72x16xf32>, vector<8x16xf32> -> vector<8x16xf32>
    %cst_68 = arith.constant 0.000000e+00 : f32
    %78 = vector.broadcast %cst_68 : f32 to vector<8x16xf32>
    %79 = arith.maximumf %77, %78 : vector<8x16xf32>
    %80 = arith.addf %79, %47 : vector<8x16xf32>
    %c0_69 = arith.constant 0 : index
    %c0_70 = arith.constant 0 : index
    %81 = vector.load %arg3[%c0_69, %c0_70] : memref<8x72xf32, #tpu.memory_space<vmem>>, vector<8x16xf32>
    tpu.vector_store %arg3[%c0_69, %c0_70], %80 {strides = array<i32>} : memref<8x72xf32, #tpu.memory_space<vmem>>, vector<8x16xf32>,
    %c0_71 = arith.constant 0 : index
    %c0_72 = arith.constant 0 : index
    %82 = vector.load %arg3[%c0_71, %c0_72] : memref<8x72xf32, #tpu.memory_space<vmem>>, vector<8x72xf32>
    %c488 = arith.constant 488 : index
    %c0_73 = arith.constant 0 : index
    %83 = vector.load %arg1[%c488, %c0_73] : memref<632x32xf32, #tpu.memory_space<vmem>>, vector<72x32xf32>
    %cst_74 = arith.constant dense<0.000000e+00> : vector<8x32xf32>
    %84 = tpu.matmul %82, %83, %cst_74 {dimension_numbers = #tpu.dot_dimension_numbers<[1], [0], [0], [1], [0, 0, 1, 1], [], []>, precision = #tpu.contract_precision<fp32>} : vector<8x72xf32>, vector<72x32xf32>, vector<8x32xf32> -> vector<8x32xf32>
    %cst_75 = arith.constant 0.000000e+00 : f32
    %85 = vector.broadcast %cst_75 : f32 to vector<8x32xf32>
    %86 = arith.maximumf %84, %85 : vector<8x32xf32>
    %87 = arith.addf %86, %35 : vector<8x32xf32>
    %c0_76 = arith.constant 0 : index
    %c0_77 = arith.constant 0 : index
    %88 = vector.load %arg3[%c0_76, %c0_77] : memref<8x72xf32, #tpu.memory_space<vmem>>, vector<8x32xf32>
    tpu.vector_store %arg3[%c0_76, %c0_77], %87 {strides = array<i32>} : memref<8x72xf32, #tpu.memory_space<vmem>>, vector<8x32xf32>,
    %c0_78 = arith.constant 0 : index
    %c0_79 = arith.constant 0 : index
    %89 = vector.load %arg3[%c0_78, %c0_79] : memref<8x72xf32, #tpu.memory_space<vmem>>, vector<8x72xf32>
    %c560 = arith.constant 560 : index
    %c0_80 = arith.constant 0 : index
    %90 = vector.load %arg1[%c560, %c0_80] : memref<632x32xf32, #tpu.memory_space<vmem>>, vector<72x32xf32>
    %cst_81 = arith.constant dense<0.000000e+00> : vector<8x32xf32>
    %91 = tpu.matmul %89, %90, %cst_81 {dimension_numbers = #tpu.dot_dimension_numbers<[1], [0], [0], [1], [0, 0, 1, 1], [], []>, precision = #tpu.contract_precision<fp32>} : vector<8x72xf32>, vector<72x32xf32>, vector<8x32xf32> -> vector<8x32xf32>
    %c0_82 = arith.constant 0 : index
    %c0_83 = arith.constant 0 : index
    %92 = vector.load %arg2[%c0_82, %c0_83] : memref<8x32xf32, #tpu.memory_space<vmem>>, vector<8x32xf32>
    tpu.vector_store %arg2[%c0_82, %c0_83], %91 {strides = array<i32>} : memref<8x32xf32, #tpu.memory_space<vmem>>, vector<8x32xf32>,
    return
  }
}

</mosaic_0001>

<bundles_post_ra>
// kernel: tpu_custom_call.1
= control target key start
LH: loop header
LB: loop body
LE: loop exit
PB: predicated region body
PF: predicated region fallthrough
CT: control target
= control target key end

     0   :  { %v8612_v1 = vmov 90   ;;  %s10010_s0 = inlined_call_operand.vmem [shape: f32[8,91], index: 0, kind: input, shape index: {}]   ;;  %s10011_s1 = inlined_call_operand.vmem [shape: f32[632,32], index: 1, kind: input, shape index: {}]   ;;  %s10012_s2 = inlined_call_operand.hbm [shape: f32[8,32], index: 2, kind: output, shape index: {}]  }
   0x1   :  { %v8648_v0 = vld [vmem:[%s10010_s0] sm:$0xff]  ;;  %8579 = vset.pattern.permute.xlu0 %v8612_v1 }
   0x2   :  { %505 = vperm.xlu0 %8579, %v8648_v0  }
   0x3   :  { %7 = vsyncpa [#allocation4], 0  ;;  %v14_v2 = vld [vmem:[%s10011_s1] sm:$0xff]  ;;  %v15_v3 = vld [vmem:[%s10011_s1 + $0x8] sm:$0xff]  ;;  %vm17_vm0 = vcmask 195584   ;;  %v8613_v13 = vmov 0.0|0.0   ;;  %v498_v34 = vlaneseq }
   0x4   :  { %v22_v4 = vand.u32 4294901760, %v14_v2  ;;  %v25_v5 = vand.u32 4294901760, %v15_v3  ;;  %v19_v6 = vsel %vm17_vm0, %v8648_v0, 0  ;;  %7861 = vmatprep.subr.bf16.mxu1 %v8613_v13  ;;  %v16_v14 = vld [vmem:[%s10011_s1 + $0x10] sm:$0xff]  ;;  %7867 = vmatprep.subr.bf16.mxu0 %v8613_v13  ;;  %v8614_v23 = vmov 0.0   ;;  %v8685_v32 = vld [vmem:[%s10011_s1 + $0x20] sm:$0xff] }
   0x5   :  { %v8658_v9 = vand.u32 4294901760, %v19_v6  ;;  %v28_v16 = vand.u32 4294901760, %v16_v14  ;;  %vm8615_vm1 = vmmov 0   ;;  %v8692_v33 = vand.u32 4294901760, %v8685_v32  ;;  %s8624_s20 = smov 96   ;;  %s8625_s23 = smov 32  }
   0x6   :  { %v101_v7 = vsub.f32 %v14_v2, %v22_v4  ;;  %v108_v8 = vsub.f32 %v15_v3, %v25_v5  ;;  %v7862_v10 = vpack.c.bf16 %v25_v5, %v22_v4  ;;  %6745 = vmatprep.mubr.msk.f32.mxu1 %vm8615_vm1, %v8614_v23  ;;  %6763 = vmatprep.mubr.msk.f32.mxu0 %vm8615_vm1, %v8614_v23  ;;  %v499_v35 = vand.u32 127, %v498_v34  ;;  %s8626_s24 = smov 104   ;;  %s8627_s0 = smov 48  }
   0x7   :  { %v90_v11 = vsub.f32 %v19_v6, %v8658_v9  ;;  %v115_v20 = vsub.f32 %v16_v14, %v28_v16  ;;  %v8616_v53 = vmov 683565275   ;;  %v8617_v55 = vmov 2475754826  }
   0x8   :  { %v102_v12 = vand.u32 4294901760, %v101_v7  ;;  %v109_v15 = vand.u32 4294901760, %v108_v8  ;;  %7863 = vmatpush3.bf16.msra.mxu1 %v7862_v10  ;;  %v7868_v30 = vpack.c.bf16 %v108_v8, %v101_v7  ;;  %v500_v36 = vcvt.s32.f32 %v499_v35 }
   0x9   :  { %v91_v17 = vand.u32 4294901760, %v90_v11  ;;  %6743 = vmatprep.subr.mxu1 %v8614_v23  ;;  %v116_v26 = vand.u32 4294901760, %v115_v20  ;;  %v8618_v58 = vmov 2131351028   ;;  %v8619_v61 = vmov 2102212464  }
   0xa   :  { %v103_v18 = vsub.f32 %v101_v7, %v102_v12  ;;  %v110_v19 = vsub.f32 %v108_v8, %v109_v15  ;;  %7869 = vmatpush3.bf16.msra.mxu0 %v7868_v30  ;;  %v7874_v31 = vpack.c.bf16 %v109_v15, %v102_v12  ;;  %v501_v37 = vmul.f32 -1.3157629, %v500_v36 }
   0xb   :  { %v92_v21 = vsub.f32 %v90_v11, %v91_v17  ;;  %v117_v28 = vsub.f32 %v115_v20, %v116_v26  ;;  %6761 = vmatprep.subr.mxu0 %v8614_v23  ;;  %v8620_v1 = vmov 920167782   ;;  %v8621_v4 = vmov 1326507024  }
   0xc   :  { %v104_v22 = vand.u32 4294901760, %v103_v18  ;;  %v111_v24 = vand.u32 4294901760, %v110_v19  ;;  %6744 = vmatpush3.msra.mxu1 %v28_v16  ;;  %v502_v38 = vmul.f32 1.442695, %v501_v37  ;;  %v8622_v15 = vmov 89  }
   0xd   :  { %v93_v25 = vand.u32 4294901760, %v92_v21  ;;  %7864 = vmatprep.subr.bf16.mxu1 %v8613_v13  ;;  %v118_v29 = vand.u32 4294901760, %v117_v28  ;;  %8580 = vset.pattern.permute.xlu0 %v8622_v15  ;;  %vm615_vm14 = vcmask 64512  }
   0xe   :  { %v7865_v27 = vpack.c.bf16 %v111_v24, %v104_v22  ;;  %6762 = vmatpush3.msra.mxu0 %v115_v20  ;;  %8582 = vpow2.f32 %v502_v38  ;;  %1631 = vperm.xlu0 %8580, %v8648_v0  }
   0xf   :  { %6746 = vmatmul.mubr.f32.vlgmr.msra.gmra.mrb[0].mxu1 %v93_v25  ;;  %7873 = vmatprep.subr.bf16.mxu0 %v8613_v13 }
  0x10   :  { %7866 = vmatpush3.bf16.msra.mxu1 %v7865_v27  ;;  %6754 = vmatprep.mubr.msk.f32.mxu1 %vm8615_vm1, %v8614_v23 }
  0x11   :  { %6752 = vmatprep.subr.mxu1 %v8614_v23  ;;  %6764 = vmatmul.mubr.f32.vlgmr.msra.gmra.mrb[0].mxu0 %v90_v11 }
  0x12   :  { %7875 = vmatpush3.bf16.msra.mxu0 %v7874_v31  ;;  %6781 = vmatprep.mubr.msk.f32.mxu0 %vm8615_vm1, %v8614_v23 }
  0x13   :  { %6779 = vmatprep.subr.mxu0 %v8614_v23 }
  0x14   :  { %6753 = vmatpush3.msra.mxu1 %v118_v29 }
  0x15   :  { %7870 = vmatprep.subr.bf16.mxu1 %v8613_v13  ;;  %6755 = vmatmul.mubr.f32.vlgmr.msra.gmra.mrb[2].mxu1 %v8658_v9 }
  0x16   :  { %7872 = vmatpush3.bf16.msra.mxu1 %v7862_v10  ;;  %6772 = vmatprep.mubr.msk.f32.mxu1 %vm8615_vm1, %v8614_v23 }
  0x17   :  { %6770 = vmatprep.subr.mxu1 %v8614_v23  ;;  %6780 = vmatpush3.msra.mxu0 %v116_v26 }
  0x18   :  { %6782 = vmatmul.mubr.f32.vlgmr.msra.gmra.mrb[2].mxu0 %v8658_v9  ;;  %6793 = vmatprep.subr.mxu0 %v8614_v23  ;;  %v8583_v39 = vpop.eup %8582 }
  0x19   :  { %6794 = vmatpush3.msra.mxu0 %v8692_v33  ;;  %6795 = vmatprep.mubr.msk.f32.mxu0 %vm8615_vm1, %v8614_v23 }
  0x1a   :  { %6771 = vmatpush3.msra.mxu1 %v28_v16  ;;  %6798 = vmatprep.subr.mxu0 %v8614_v23 }
  0x1b   :  { %7876 = vmatprep.subr.bf16.mxu1 %v8613_v13  ;;  %6773 = vmatmul.mubr.f32.vlgmr.msra.gmra.mrb[4].mxu1 %v91_v17 }
  0x1c   :  { %7878 = vmatpush3.bf16.msra.mxu1 %v7862_v10  ;;  %6790 = vmatprep.mubr.msk.f32.mxu1 %vm8615_vm1, %v8614_v23 }
  0x1d   :  { %6788 = vmatprep.subr.mxu1 %v8614_v23 }
  0x20   :  { %6789 = vmatpush3.msra.mxu1 %v28_v16 }
  0x21   :  { %6791 = vmatmul.mubr.f32.vlgmr.msra.gmra.mrb[6].mxu1 %v8658_v9  ;;  %7879 = vmatprep.subr.bf16.mxu1 %v8613_v13 }
  0x22   :  { %6871 = vmatprep.mubr.msk.f32.mxu1 %vm8615_vm1, %v8614_v23 }
  0x81   :  { %v506_v40 = vpop.permute.xlu0 %505 }
  0x82   :  { %v8707_v41 = vmul.f32 %v8583_v39, %v506_v40 }
  0x84   :  { %v513_v42 = vand.u32 2139095040, %v8707_v41  ;;  %v510_v45 = vand.u32 2147483647, %v8707_v41  ;;  %vm512_vm9 = vcmp.lt.s32.totalorder %v8707_v41, 0  ;;  %vm602_vm15 = vweird.f32 %v8707_v41 }
  0x86   :  { %v514_v43 = vshrl.u32 %v513_v42, 23  ;;  %v517_v47 = vand.u32 8388607, %v510_v45  ;;  %vm511_vm10 = vcmp.le.f32.partialorder %v510_v45, 0.7853982 }
  0x88   :  { %v6202_v44 = vadd.s32 4294967169, %v514_v43  ;;  %v518_v52 = vor.u32 8388608, %v517_v47 }
  0x8a   :  { %v520_v46 = vadd.s32 1, %v6202_v44  ;;  %v558_v21 = vshll.u32 %v518_v52, 8 }
  0x8c   :  { %vm521_vm2 = vcmp.gt.s32.totalorder %v520_v46, 0 }
  0x8d   :  { %v522_v48 = vsel %vm521_vm2, %v520_v46, 0 }
  0x8e   :  { %v524_v49 = vand.u32 31, %v522_v48  ;;  %v523_v50 = vshrl.u32 %v522_v48, 5 }
  0x90   :  { %v525_v51 = vsub.s32 32, %v524_v49  ;;  %v527_v54 = vshll.u32 %v8616_v53, %v524_v49  ;;  %v530_v56 = vshll.u32 %v8617_v55, %v524_v49  ;;  %v533_v60 = vshll.u32 %v8618_v58, %v524_v49 }
  0x91   :  { %v536_v63 = vshll.u32 %v8619_v61, %v524_v49  ;;  %v539_v3 = vshll.u32 %v8620_v1, %v524_v49  ;;  %vm542_vm3 = vcmp.lt.s32.totalorder %v523_v50, 1  ;;  %vm545_vm4 = vcmp.lt.s32.totalorder %v523_v50, 4 }
  0x92   :  { %v528_v57 = vshrl.u32 %v8617_v55, %v525_v51  ;;  %v531_v59 = vshrl.u32 %v8618_v58, %v525_v51  ;;  %v534_v62 = vshrl.u32 %v8619_v61, %v525_v51  ;;  %v537_v2 = vshrl.u32 %v8620_v1, %v525_v51 }
  0x93   :  { %v540_v5 = vshrl.u32 %v8621_v4, %v525_v51  ;;  %v526_v16 = vshrl.u32 %v8616_v53, %v525_v51  ;;  %vm544_vm5 = vcmp.lt.s32.totalorder %v523_v50, 3  ;;  %vm543_vm6 = vcmp.lt.s32.totalorder %v523_v50, 2 }
  0x94   :  { %v529_v6 = vor.u32 %v528_v57, %v527_v54  ;;  %v532_v7 = vor.u32 %v531_v59, %v530_v56  ;;  %v535_v8 = vor.u32 %v534_v62, %v533_v60  ;;  %v538_v9 = vor.u32 %v537_v2, %v536_v63 }
  0x95   :  { %v541_v10 = vor.u32 %v540_v5, %v539_v3  ;;  %v8623_v57 = vmov 88  }
  0x96   :  { %v547_v11 = vsel %vm545_vm4, %v535_v8, 2102212464  ;;  %v550_v12 = vsel %vm542_vm3, %v529_v6, %v532_v7  ;;  %v554_v14 = vsel %vm542_vm3, %v532_v7, %v535_v8  ;;  %v551_v17 = vsel %vm545_vm4, %v538_v9, 920167782  ;;  %8581 = vset.pattern.permute.xlu1 %v8623_v57 }
  0x97   :  { %v555_v18 = vsel %vm545_vm4, %v541_v10, 1326507024  ;;  %v552_v19 = vsel %vm544_vm5, %v535_v8, %v551_v17  ;;  %v546_v22 = vsel %vm542_vm3, %v526_v16, %v529_v6  ;;  %v548_v24 = vsel %vm544_vm5, %v532_v7, %v547_v11  ;;  %1626 = vperm.xlu1 %8581, %v8648_v0  }
  0x98   :  { %v556_v20 = vsel %vm544_vm5, %v538_v9, %v555_v18  ;;  %v553_v25 = vsel %vm543_vm6, %v550_v12, %v552_v19  ;;  %v549_v31 = vsel %vm543_vm6, %v546_v22, %v548_v24  ;;  %v697_v12 = vsub.f32 %v8685_v32, %v8692_v33 }
  0x99   :  { %v557_v26 = vsel %vm543_vm6, %v554_v14, %v556_v20  ;;  %v8720_v29 = vmul.u32.u64.low %v558_v21, %v553_v25  ;;  %v8721_v30 = vmul.u32.u64.high %v558_v21, %v553_v25, %v8720_v29  ;;  %v565_v35 = vmul.u32 %v558_v21, %v549_v31 }
  0x9a   :  { %v8717_v27 = vmul.u32.u64.low %v558_v21, %v557_v26  ;;  %v8718_v28 = vmul.u32.u64.high %v558_v21, %v557_v26, %v8717_v27  ;;  %v698_v17 = vand.u32 4294901760, %v697_v12  ;;  %vm1640_vm4 = vcmask 588800  }
  0x9b   :  { %v568_v34 = vadd.s32 1, %v8721_v30  ;;  %1641 = vst.msk [vmem:[#allocation2] sm:$0xff] %vm1640_vm4, %v8614_v23  ;;  %vm1646_vm5 = vcmask 392448   ;;  %vm1652_vm6 = vcmask 523648  }
  0x9c   :  { %vm567_vm7 = vc.u32 %v8718_v28, %v8720_v29  ;;  %v566_v49 = vadd.s32 %v8720_v29, %v8718_v28  ;;  %v699_v20 = vsub.f32 %v697_v12, %v698_v17 }
  0x9d   :  { %v569_v36 = vsel %vm567_vm7, %v568_v34, %v8721_v30  ;;  %v1173_v30 = vld [vmem:[%s10011_s1 + $0x28] sm:$0xff]  ;;  %vm1654_vm7 = vcmask 531968  }
  0x9e   :  { %v570_v37 = vadd.s32 %v569_v36, %v565_v35  ;;  %v700_v24 = vand.u32 4294901760, %v699_v20  ;;  %v1178_v34 = vand.u32 4294901760, %v1173_v30  ;;  %v1669_v20 = vld [vmem:[%s10011_s1 + $0x68] sm:$0xff] }
  0xa0   :  { %v571_v38 = vadd.s32 536870912, %v570_v37 }
  0xa2   :  { %v572_v39 = vshrl.u32 %v571_v38, 30 }
  0xa4   :  { %v573_v40 = vshll.u32 %v572_v39, 30  ;;  %v596_v62 = vsub.s32 4, %v572_v39 }
  0xa6   :  { %v574_v42 = vsub.s32 %v570_v37, %v573_v40  ;;  %v597_v2 = vsel %vm512_vm9, %v596_v62, %v572_v39 }
  0xa7   :  { %v599_v4 = vsel %vm511_vm10, 0, %v597_v2 }
  0xa8   :  { %v576_v43 = vsub.s32 0, %v574_v42  ;;  %v603_v5 = vadd.s32 3, %v599_v4  ;;  %v1163_v32 = vand.u32 3, %v599_v4 }
  0xaa   :  { %v6203_v44 = vmin.u32 %v576_v43, %v574_v42  ;;  %v604_v6 = vand.u32 3, %v603_v5  ;;  %vm1165_vm0 = vcmp.eq.s32.totalorder %v1163_v32, 0  ;;  %vm1168_vm2 = vcmp.eq.s32.totalorder %v1163_v32, 2  ;;  %v1632_v43 = vpop.permute.xlu0 %1631 }
  0xab   :  { %vm1164_vm3 = vcmp.lt.s32.totalorder %v1163_v32, 2 }
  0xac   :  { %v578_v46 = vclz %v6203_v44  ;;  %vm609_vm11 = vcmp.eq.s32.totalorder %v604_v6, 2  ;;  %vm606_vm12 = vcmp.eq.s32.totalorder %v604_v6, 0  ;;  %vm605_vm13 = vcmp.lt.s32.totalorder %v604_v6, 2 }
  0xad   :  { %v1634_v44 = vmul.f32 %v1632_v43, %v8648_v0 }
  0xae   :  { %v6204_v47 = vadd.s32 4294967294, %v578_v46 }
  0xaf   :  { %1636 = vrot.lane.b32.xlu1 %v1634_v44, %s8624_s20 }
  0xb0   :  { %vm6205_vm8 = vcmp.lt.s32.totalorder %v6204_v47, 0 }
  0xb1   :  { %v581_v48 = vsel %vm6205_vm8, 0, %v6204_v47  ;;  %vm1660_vm8 = vcmask 261120  }
  0xb2   :  { %v582_v50 = vsub.s32 32, %v581_v48  ;;  %v586_v51 = vsub.s32 4294967266, %v581_v48  ;;  %v583_v52 = vshll.u32 %v574_v42, %v581_v48 }
  0xb4   :  { %v584_v53 = vshrl.u32 %v566_v49, %v582_v50  ;;  %v587_v54 = vadd.s32 127, %v586_v51 }
  0xb6   :  { %v585_v55 = vor.u32 %v584_v53, %v583_v52  ;;  %v588_v56 = vshll.u32 %v587_v54, 23 }
  0xb8   :  { %v589_v58 = vor.u32 4788187, %v588_v56  ;;  %v592_v60 = vcvt.s32.f32 %v585_v55 }
  0xba   :  { %v590_v59 = vand.u32 2147483647, %v589_v58 }
  0xbc   :  { %v593_v61 = vmul.f32 %v592_v60, %v590_v59  ;;  %v6201_v60 = vld [vmem:[%s10011_s1 + $0x18] ss:$0 sm:$0xff] }
  0xbe   :  { %v594_v63 = vxor.u32 2147483648, %v593_v61 }
  0xc0   :  { %v595_v1 = vsel %vm512_vm9, %v594_v63, %v593_v61  ;;  %vm2226_vm9 = vcmask 130048  }
  0xc1   :  { %v598_v3 = vsel %vm511_vm10, %v8707_v41, %v595_v1  ;;  %v1255_v41 = vsub.f32 %v1173_v30, %v1178_v34  ;;  %vm3357_vm10 = vcmask 31744  }
  0xc2   :  { %8584 = vcosq.f32 %v598_v3 }
  0xc3   :  { %8586 = vsinq.f32 %v598_v3  ;;  %v1256_v37 = vand.u32 4294901760, %v1255_v41 }
  0xc5   :  { %v1257_v39 = vsub.f32 %v1255_v41, %v1256_v37 }
  0xc7   :  { %v1258_v42 = vand.u32 4294901760, %v1257_v39 }
  0xcc   :  { %v8585_v7 = vpop.eup %8584 }
  0xcd   :  { %v8587_v8 = vpop.eup %8586  ;;  %v610_v9 = vxor.u32 2147483648, %v8585_v7 }
  0xce   :  { %v607_v10 = vxor.u32 2147483648, %v8587_v8 }
  0xcf   :  { %v611_v11 = vsel %vm609_vm11, %v610_v9, %v8587_v8  ;;  %v1170_v27 = vsel %vm1168_vm2, %v610_v9, %v8587_v8  ;;  %v1664_v8 = vld [vmem:[%s10011_s1 + $0x40] sm:$0xff] }
  0xd0   :  { %v608_v45 = vsel %vm606_vm12, %v8585_v7, %v607_v10  ;;  %v1167_v26 = vsel %vm1165_vm0, %v8585_v7, %v607_v10  ;;  %v1663_v7 = vld [vmem:[%s10011_s1 + $0x38] sm:$0xff]  ;;  %v1679_v9 = vand.u32 4294901760, %v1664_v8 }
  0xd1   :  { %v612_v14 = vsel %vm605_vm13, %v608_v45, %v611_v11  ;;  %v1171_v28 = vsel %vm1164_vm3, %v1167_v26, %v1170_v27  ;;  %v1665_v45 = vld [vmem:[%s10011_s1 + $0x48] sm:$0xff] }
  0xd2   :  { %v613_v15 = vsel %vm602_vm15, nan, %v612_v14  ;;  %v1172_v29 = vsel %vm602_vm15, nan, %v1171_v28  ;;  %v1666_v14 = vld [vmem:[%s10011_s1 + $0x50] sm:$0xff] }
  0xd3   :  { %v617_v16 = vsel %vm615_vm14, %v613_v15, 0  ;;  %v1175_v31 = vsel %vm615_vm14, %v1172_v29, 0  ;;  %v1667_v15 = vld [vmem:[%s10011_s1 + $0x58] sm:$0xff]  ;;  %v6206_v29 = vld [vmem:[%s10011_s1 + $0x30] ss:$0 sm:$0xff] }
  0xd4   :  { %v685_v18 = vand.u32 4294901760, %v617_v16  ;;  %v1243_v35 = vand.u32 4294901760, %v1175_v31 }
  0xd6   :  { %v686_v19 = vsub.f32 %v617_v16, %v685_v18  ;;  %v1244_v36 = vsub.f32 %v1175_v31, %v1243_v35  ;;  %v1682_v16 = vand.u32 4294901760, %v1665_v45 }
  0xd8   :  { %v687_v21 = vand.u32 4294901760, %v686_v19  ;;  %v1245_v38 = vand.u32 4294901760, %v1244_v36  ;;  %v8822_v26 = vsub.f32 %v1665_v45, %v1682_v16 }
  0xda   :  { %v688_v22 = vsub.f32 %v686_v19, %v687_v21  ;;  %v1246_v40 = vsub.f32 %v1244_v36, %v1245_v38 }
  0xdc   :  { %v689_v25 = vand.u32 4294901760, %v688_v22 }
  0xde   :  { %6796 = vmatmul.mubr.f32.vlgmr.msra.gmra.mrb[4].mxu0 %v689_v25 }
  0xdf   :  { %6799 = vmatpush3.msra.mxu0 %v700_v24  ;;  %6800 = vmatprep.mubr.msk.f32.mxu0 %vm8615_vm1, %v8614_v23  ;;  %v1694_v24 = vand.u32 4294901760, %v1669_v20 }
  0xe0   :  { %6803 = vmatprep.subr.mxu0 %v8614_v23 }
  0xe1   :  { %v8833_v31 = vsub.f32 %v1669_v20, %v1694_v24 }
  0xe2   :  { %v95_v46 = vpop.f32.mrb[0].mxu1 }
  0xe3   :  { %v6747_v47 = vpop.f32.mrb[1].mxu1 }
  0xe4   :  { %v259_v51 = vpop.f32.mrb[0].mxu0 }
  0xe5   :  { %v6765_v53 = vpop.f32.mrb[1].mxu0 }
  0xe6   :  { %6801 = vmatmul.mubr.f32.vlgmr.msra.gmra.mrb[4].mxu0 %v685_v18 }
  0xe7   :  { %6804 = vmatpush3.msra.mxu0 %v697_v12  ;;  %6805 = vmatprep.mubr.msk.f32.mxu0 %vm8615_vm1, %v8614_v23  ;;  %v8798_v12 = vsub.f32 %v1664_v8, %v1679_v9 }
  0xe8   :  { %6808 = vmatprep.subr.mxu0 %v8614_v23  ;;  %v181_v48 = vpop.f32.mrb[2].mxu1 }
  0xe9   :  { %v182_v49 = vadd.f32 %v181_v48, %v95_v46  ;;  %v6756_v50 = vpop.f32.mrb[3].mxu1 }
  0xeb   :  { %v260_v52 = vadd.f32 %v259_v51, %v182_v49  ;;  %v415_v57 = vpop.f32.mrb[2].mxu0  ;;  %v1776_v49 = vand.u32 4294901760, %v8822_v26 }
  0xec   :  { %v6783_v59 = vpop.f32.mrb[3].mxu0 }
  0xee   :  { %6806 = vmatmul.mubr.f32.vlgmr.msra.gmra.mrb[4].mxu0 %v686_v19  ;;  %v335_v54 = vpop.f32.mrb[4].mxu1  ;;  %v1688_v19 = vand.u32 4294901760, %v1667_v15 }
  0xef   :  { %6809 = vmatpush3.msra.mxu0 %v8692_v33  ;;  %6810 = vmatprep.mubr.msk.f32.mxu0 %vm8615_vm1, %v8614_v23  ;;  %v336_v55 = vadd.f32 %v335_v54, %v260_v52  ;;  %v6774_v56 = vpop.f32.mrb[5].mxu1  ;;  %v1777_v52 = vsub.f32 %v8822_v26, %v1776_v49 }
  0xf0   :  { %6813 = vmatprep.subr.mxu0 %v8614_v23  ;;  %v8826_v28 = vsub.f32 %v1667_v15, %v1688_v19 }
  0xf1   :  { %v416_v58 = vadd.f32 %v415_v57, %v336_v55  ;;  %v1778_v54 = vand.u32 4294901760, %v1777_v52 }
  0xf2   :  { %v1790_v56 = vand.u32 4294901760, %v8826_v28 }
  0xf4   :  { %v489_v61 = vpop.f32.mrb[6].mxu1  ;;  %v1791_v59 = vsub.f32 %v8826_v28, %v1790_v56 }
  0xf5   :  { %v490_v62 = vadd.f32 %v489_v61, %v416_v58  ;;  %v6792_v63 = vpop.f32.mrb[7].mxu1 }
  0xf6   :  { %6811 = vmatmul.mubr.f32.vlgmr.msra.gmra.mrb[4].mxu0 %v687_v21  ;;  %v1670_v21 = vld [vmem:[%s10011_s1 + $0x70] sm:$0xff]  ;;  %v1792_v61 = vand.u32 4294901760, %v1791_v59  ;;  %v1804_v63 = vand.u32 4294901760, %v8833_v31 }
  0xf7   :  { %6814 = vmatpush3.msra.mxu0 %v698_v17  ;;  %6815 = vmatprep.mubr.msk.f32.mxu0 %vm8615_vm1, %v8614_v23  ;;  %v497_v1 = vadd.f32 %v6201_v60, %v490_v62  ;;  %v1685_v17 = vand.u32 4294901760, %v1666_v14  ;;  %v1697_v25 = vand.u32 4294901760, %v1670_v21 }
  0xf8   :  { %6818 = vmatprep.subr.mxu0 %v8614_v23 }
  0xf9   :  { %1643 = vrot.lane.b32.xlu1 %v497_v1, %s8625_s23  ;;  %v8820_v32 = vpack.c.bf16 %v1685_v17, %v1682_v16  ;;  %v8824_v27 = vsub.f32 %v1666_v14, %v1685_v17  ;;  %v8842_v39 = vpack.c.bf16 %v1697_v25, %v1694_v24 }
  0xfb   :  { %v1783_v50 = vand.u32 4294901760, %v8824_v27 }
  0xfd   :  { %v1784_v53 = vsub.f32 %v8824_v27, %v1783_v50  ;;  %v8883_v15 = vpack.c.bf16 %v1783_v50, %v1776_v49  ;;  %v2233_v50 = vld [vmem:[%s10011_s1 + $0xa0] sm:$0xff] }
  0xfe   :  { %6816 = vmatmul.mubr.f32.vlgmr.msra.gmra.mrb[4].mxu0 %v685_v18 }
  0xff   :  { %6819 = vmatpush3.msra.mxu0 %v8692_v33  ;;  %6820 = vmatprep.mubr.msk.f32.mxu0 %vm8615_vm1, %v8614_v23  ;;  %v1247_v33 = vand.u32 4294901760, %v1246_v40  ;;  %v8848_v40 = vld [vmem:[%s10011_s1 + $0x78] sm:$0xff]  ;;  %v1785_v55 = vand.u32 4294901760, %v1784_v53 }
 0x100   :  { %6823 = vmatprep.subr.mxu0 %v8614_v23  ;;  %v8854_v43 = vand.u32 4294901760, %v8848_v40 }
 0x101   :  { %v7895_v58 = vpack.c.bf16 %v1785_v55, %v1778_v54  ;;  %v2254_v54 = vand.u32 4294901760, %v2233_v50 }
 0x106   :  { %6821 = vmatmul.mubr.f32.vlgmr.msra.gmra.mrb[4].mxu0 %v685_v18  ;;  %v1668_v18 = vld [vmem:[%s10011_s1 + $0x60] sm:$0xff] }
 0x107   :  { %6824 = vmatpush3.msra.mxu0 %v1178_v34  ;;  %6825 = vmatprep.mubr.msk.f32.mxu0 %vm8615_vm1, %v8614_v23  ;;  %v1691_v22 = vand.u32 4294901760, %v1668_v18 }
 0x108   :  { %6828 = vmatprep.subr.mxu0 %v8614_v23 }
 0x109   :  { %v8831_v30 = vsub.f32 %v1668_v18, %v1691_v22 }
 0x10b   :  { %v1797_v57 = vand.u32 4294901760, %v8831_v30 }
 0x10d   :  { %v1798_v60 = vsub.f32 %v8831_v30, %v1797_v57  ;;  %v8885_v16 = vpack.c.bf16 %v1797_v57, %v1790_v56 }
 0x10e   :  { %6826 = vmatmul.mubr.f32.vlgmr.msra.gmra.mrb[4].mxu0 %v1247_v33  ;;  %v1769_v33 = vand.u32 4294901760, %v8798_v12 }
 0x10f   :  { %6829 = vmatpush3.msra.mxu0 %v1258_v42  ;;  %6830 = vmatprep.mubr.msk.f32.mxu0 %vm8615_vm1, %v8614_v23  ;;  %v1799_v62 = vand.u32 4294901760, %v1798_v60  ;;  %v2235_v60 = vld [vmem:[%s10011_s1 + $0xb0] sm:$0xff] }
 0x110   :  { %6833 = vmatprep.subr.mxu0 %v8614_v23  ;;  %v1770_v46 = vsub.f32 %v8798_v12, %v1769_v33 }
 0x112   :  { %v1771_v48 = vand.u32 4294901760, %v1770_v46  ;;  %v1817_v46 = vsub.f32 %v8848_v40, %v8854_v43 }
 0x116   :  { %6831 = vmatmul.mubr.f32.vlgmr.msra.gmra.mrb[4].mxu0 %v1243_v35  ;;  %v1627_v2 = vpop.permute.xlu1 %1626 }
 0x117   :  { %6834 = vmatpush3.msra.mxu0 %v1255_v41  ;;  %6835 = vmatprep.mubr.msk.f32.mxu0 %vm8615_vm1, %v8614_v23  ;;  %v1629_v3 = vmul.f32 %v1627_v2, %v8648_v0  ;;  %v1676_v0 = vand.u32 4294901760, %v1663_v7  ;;  %v8838_v41 = vpack.c.bf16 %v1691_v22, %v1688_v19  ;;  %v7898_v2 = vpack.c.bf16 %v1799_v62, %v1792_v61  ;;  %v2236_v61 = vld [vmem:[%s10011_s1 + $0xb8] sm:$0xff] }
 0x118   :  { %6838 = vmatprep.subr.mxu0 %v8614_v23 }
 0x119   :  { %v8794_v10 = vpack.c.bf16 %v1679_v9, %v1676_v0  ;;  %v8796_v11 = vsub.f32 %v1663_v7, %v1676_v0  ;;  %v7907_v0 = vpack.c.bf16 %v8824_v27, %v8822_v26  ;;  %v7910_v9 = vpack.c.bf16 %v8831_v30, %v8826_v28 }
 0x11b   :  { %7881 = vmatpush3.bf16.msra.mxu1 %v8794_v10  ;;  %v1762_v42 = vand.u32 4294901760, %v8796_v11  ;;  %v7904_v8 = vpack.c.bf16 %v8798_v12, %v8796_v11  ;;  %v8897_v12 = vld [vmem:[%s10011_s1 + $0x88] sm:$0xff] }
 0x11c   :  { %7882 = vmatprep.subr.bf16.mxu1 %v8613_v13  ;;  %v2245_v19 = vand.u32 4294901760, %v8897_v12 }
 0x11d   :  { %v1763_v44 = vsub.f32 %v8796_v11, %v1762_v42  ;;  %v8881_v14 = vpack.c.bf16 %v1769_v33, %v1762_v42  ;;  %v8892_v11 = vld [vmem:[%s10011_s1 + $0x80] sm:$0xff] }
 0x11e   :  { %6836 = vmatmul.mubr.f32.vlgmr.msra.gmra.mrb[4].mxu0 %v1244_v36  ;;  %v2242_v18 = vand.u32 4294901760, %v8892_v11 }
 0x11f   :  { %6839 = vmatpush3.msra.mxu0 %v1178_v34  ;;  %6840 = vmatprep.mubr.msk.f32.mxu0 %vm8615_vm1, %v8614_v23  ;;  %v1764_v47 = vand.u32 4294901760, %v1763_v44 }
 0x120   :  { %6843 = vmatprep.subr.mxu0 %v8614_v23  ;;  %7884 = vmatpush3.bf16.msra.mxu1 %v8820_v32  ;;  %v8904_v20 = vsub.f32 %v8892_v11, %v2242_v18 }
 0x121   :  { %v1637_v4 = vpop.permute.xlu1 %1636  ;;  %7885 = vmatprep.subr.bf16.mxu1 %v8613_v13  ;;  %v7892_v51 = vpack.c.bf16 %v1771_v48, %v1764_v47  ;;  %v1818_v47 = vand.u32 4294901760, %v1817_v46 }
 0x122   :  { %v1639_v5 = vadd.f32 %v1637_v4, %v1629_v3  ;;  %v1805_v3 = vsub.f32 %v8833_v31, %v1804_v63  ;;  %v2328_v22 = vand.u32 4294901760, %v8904_v20 }
 0x123   :  { %v1819_v48 = vsub.f32 %v1817_v46, %v1818_v47 }
 0x124   :  { %1657 = vrot.lane.b32.xlu1 %v1639_v5, %s8626_s24  ;;  %7887 = vmatpush3.bf16.msra.mxu1 %v8838_v41  ;;  %v1806_v5 = vand.u32 4294901760, %v1805_v3  ;;  %v2260_v3 = vand.u32 4294901760, %v2235_v60 }
 0x125   :  { %7888 = vmatprep.subr.bf16.mxu1 %v8613_v13  ;;  %v1820_v49 = vand.u32 4294901760, %v1819_v48 }
 0x126   :  { %6841 = vmatmul.mubr.f32.vlgmr.msra.gmra.mrb[4].mxu0 %v1245_v38 }
 0x127   :  { %6844 = vmatpush3.msra.mxu0 %v1256_v37  ;;  %6845 = vmatprep.mubr.msk.f32.mxu0 %vm8615_vm1, %v8614_v23 }
 0x128   :  { %6848 = vmatprep.subr.mxu0 %v8614_v23  ;;  %7890 = vmatpush3.bf16.msra.mxu1 %v8842_v39 }
 0x129   :  { %6869 = vmatprep.subr.mxu1 %v8614_v23 }
 0x12c   :  { %6870 = vmatpush3.msra.mxu1 %v8854_v43 }
 0x12d   :  { %7891 = vmatprep.subr.bf16.mxu1 %v8613_v13 }
 0x12e   :  { %6846 = vmatmul.mubr.f32.vlgmr.msra.gmra.mrb[4].mxu0 %v1243_v35 }
 0x12f   :  { %6849 = vmatpush3.msra.mxu0 %v1178_v34  ;;  %6850 = vmatprep.mubr.msk.f32.mxu0 %vm8615_vm1, %v8614_v23  ;;  %v8835_v34 = vsub.f32 %v1670_v21, %v1697_v25  ;;  %v8909_v21 = vsub.f32 %v8897_v12, %v2245_v19  ;;  %v2329_v25 = vsub.f32 %v8904_v20, %v2328_v22 }
 0x130   :  { %7963 = vmatprep.subr.bf16.mxu0 %v8613_v13 }
 0x131   :  { %v1811_v1 = vand.u32 4294901760, %v8835_v34  ;;  %v7913_v45 = vpack.c.bf16 %v8835_v34, %v8833_v31  ;;  %v2335_v24 = vand.u32 4294901760, %v8909_v21  ;;  %v2330_v27 = vand.u32 4294901760, %v2329_v25 }
 0x132   :  { %v8628_v31 = vmov 1.0  }
 0x133   :  { %v1812_v4 = vsub.f32 %v8835_v34, %v1811_v1  ;;  %v8887_v17 = vpack.c.bf16 %v1811_v1, %v1804_v63  ;;  %v2336_v26 = vsub.f32 %v8909_v21, %v2335_v24 }
 0x135   :  { %v2337_v28 = vand.u32 4294901760, %v2336_v26  ;;  %v9034_v26 = vpack.c.bf16 %v2245_v19, %v2242_v18 }
 0x136   :  { %6851 = vmatmul.mubr.f32.vlgmr.msra.gmra.mrb[4].mxu0 %v1243_v35 }
 0x137   :  { %7018 = vmatprep.mubr.msk.f32.mxu0 %vm8615_vm1, %v8614_v23 }
 0x16b   :  { %v1644_v6 = vpop.permute.xlu1 %1643 }
 0x16c   :  { %1647 = vst.msk [vmem:[#allocation2] sm:$0xff] %vm1646_vm5, %v1644_v6  ;;  %v1813_v6 = vand.u32 4294901760, %v1812_v4  ;;  %v2263_v4 = vand.u32 4294901760, %v2236_v61 }
 0x16e   :  { %v7901_v7 = vpack.c.bf16 %v1813_v6, %v1806_v5 }
 0x196   :  { %v8920_v34 = vpop.permute.xlu1 %1657 }
 0x209   :  { %v1619_v35 = vpop.f32.mrb[4].mxu0 }
 0x20a   :  { %v8455_v36 = vadd.f32 %v6206_v29, %v1619_v35  ;;  %v6852_v37 = vpop.f32.mrb[5].mxu0  ;;  %v7964_v29 = vpack.c.bf16 %v2337_v28, %v2330_v27 }
 0x20c   :  { %v1624_v38 = vmax.f32 %v8455_v36, 0.0  ;;  %7965 = vmatpush3.bf16.msra.mxu0 %v7964_v29 }
 0x20d   :  { %7966 = vmatprep.subr.bf16.mxu0 %v8613_v13 }
 0x20e   :  { %1649 = vrot.lane.b32.xlu0 %v1624_v38, %s8627_s0 }
 0x280   :  { %v1650_v30 = vpop.permute.xlu0 %1649 }
 0x281   :  { %1653 = vst.msk [vmem:[#allocation2] sm:$0xff] %vm1652_vm6, %v1650_v30 }
 0x282   :  { %1655 = vst.msk [vmem:[#allocation2] sm:$0xff] %vm1654_vm7, %v8628_v31 }
 0x283   :  { %1661 = vst.msk [vmem:[#allocation2] sm:$0xff] %vm1660_vm8, %v8920_v34 }
 0x28a   :  { %v1662_v35 = vld [vmem:[#allocation2] sm:$0xff] }
 0x28b   :  { %v1673_v36 = vsel %vm1640_vm4, %v1662_v35, 0 }
 0x28c   :  { %v8925_v37 = vand.u32 4294901760, %v1673_v36 }
 0x28e   :  { %v1750_v38 = vsub.f32 %v1673_v36, %v8925_v37 }
 0x290   :  { %v1751_v42 = vand.u32 4294901760, %v1750_v38 }
 0x292   :  { %v1752_v33 = vsub.f32 %v1750_v38, %v1751_v42 }
 0x294   :  { %v1753_v44 = vand.u32 4294901760, %v1752_v33 }
 0x296   :  { %6872 = vmatmul.mubr.f32.vlgmr.msra.gmra.mrb[8].mxu1 %v1753_v44 }
 0x297   :  { %7893 = vmatpush3.bf16.msra.mxu1 %v7892_v51  ;;  %6892 = vmatprep.mubr.msk.f32.mxu1 %vm8615_vm1, %v8614_v23  ;;  %v2234_v51 = vld [vmem:[%s10011_s1 + $0xa8] sm:$0xff] }
 0x298   :  { %7894 = vmatprep.subr.bf16.mxu1 %v8613_v13  ;;  %v2257_v55 = vand.u32 4294901760, %v2234_v51 }
 0x29a   :  { %v9006_v59 = vsub.f32 %v2234_v51, %v2257_v55  ;;  %v9051_v19 = vpack.c.bf16 %v2257_v55, %v2254_v54 }
 0x29b   :  { %7896 = vmatpush3.bf16.msra.mxu1 %v7895_v58  ;;  %v9004_v58 = vsub.f32 %v2233_v50, %v2254_v54 }
 0x29c   :  { %7897 = vmatprep.subr.bf16.mxu1 %v8613_v13 }
 0x29d   :  { %v2356_v1 = vand.u32 4294901760, %v9004_v58 }
 0x29f   :  { %7899 = vmatpush3.bf16.msra.mxu1 %v7898_v2  ;;  %v2363_v2 = vand.u32 4294901760, %v9006_v59  ;;  %v2357_v6 = vsub.f32 %v9004_v58, %v2356_v1 }
 0x2a0   :  { %7900 = vmatprep.subr.bf16.mxu1 %v8613_v13 }
 0x2a3   :  { %7902 = vmatpush3.bf16.msra.mxu1 %v7901_v7  ;;  %v2364_v7 = vsub.f32 %v9006_v59, %v2363_v2 }
 0x2a4   :  { %6890 = vmatprep.subr.mxu1 %v8614_v23 }
 0x2a7   :  { %6891 = vmatpush3.msra.mxu1 %v1820_v49 }
 0x2a8   :  { %6893 = vmatmul.mubr.f32.vlgmr.msra.gmra.mrb[8].mxu1 %v8925_v37  ;;  %7903 = vmatprep.subr.bf16.mxu1 %v8613_v13 }
 0x2a9   :  { %7905 = vmatpush3.bf16.msra.mxu1 %v7904_v8  ;;  %6913 = vmatprep.mubr.msk.f32.mxu1 %vm8615_vm1, %v8614_v23  ;;  %v9018_v8 = vsub.f32 %v2235_v60, %v2260_v3 }
 0x2aa   :  { %7906 = vmatprep.subr.bf16.mxu1 %v8613_v13 }
 0x2ad   :  { %7908 = vmatpush3.bf16.msra.mxu1 %v7907_v0  ;;  %v9020_v0 = vsub.f32 %v2236_v61, %v2263_v4 }
 0x2ae   :  { %7909 = vmatprep.subr.bf16.mxu1 %v8613_v13 }
 0x2af   :  { %v7985_v33 = vpack.c.bf16 %v9020_v0, %v9018_v8 }
 0x2b1   :  { %7911 = vmatpush3.bf16.msra.mxu1 %v7910_v9  ;;  %v2358_v9 = vand.u32 4294901760, %v2357_v6 }
 0x2b2   :  { %7912 = vmatprep.subr.bf16.mxu1 %v8613_v13 }
 0x2b5   :  { %7914 = vmatpush3.bf16.msra.mxu1 %v7913_v45  ;;  %v2365_v45 = vand.u32 4294901760, %v2364_v7 }
 0x2b6   :  { %6911 = vmatprep.subr.mxu1 %v8614_v23 }
 0x2b9   :  { %6912 = vmatpush3.msra.mxu1 %v1817_v46  ;;  %v8006_v46 = vpack.c.bf16 %v2363_v2, %v2356_v1  ;;  %v2800_v1 = vld [vmem:[%s10011_s1 + $0xf8] sm:$0xff]  ;;  %v2801_v2 = vld [vmem:[%s10011_s1 + $0x100] sm:$0xff] }
 0x2ba   :  { %6914 = vmatmul.mubr.f32.vlgmr.msra.gmra.mrb[8].mxu1 %v1750_v38  ;;  %7915 = vmatprep.subr.bf16.mxu1 %v8613_v13 }
 0x2bb   :  { %7917 = vmatpush3.bf16.msra.mxu1 %v8794_v10  ;;  %6934 = vmatprep.mubr.msk.f32.mxu1 %vm8615_vm1, %v8614_v23 }
 0x2bc   :  { %7918 = vmatprep.subr.bf16.mxu1 %v8613_v13 }
 0x2bf   :  { %7920 = vmatpush3.bf16.msra.mxu1 %v8820_v32 }
 0x2c0   :  { %7921 = vmatprep.subr.bf16.mxu1 %v8613_v13 }
 0x2c3   :  { %7923 = vmatpush3.bf16.msra.mxu1 %v8838_v41 }
 0x2c4   :  { %7924 = vmatprep.subr.bf16.mxu1 %v8613_v13 }
 0x2c7   :  { %7926 = vmatpush3.bf16.msra.mxu1 %v8842_v39 }
 0x2c8   :  { %6932 = vmatprep.subr.mxu1 %v8614_v23 }
 0x2cb   :  { %6933 = vmatpush3.msra.mxu1 %v8854_v43 }
 0x2cc   :  { %6935 = vmatmul.mubr.f32.vlgmr.msra.gmra.mrb[8].mxu1 %v1751_v42  ;;  %7927 = vmatprep.subr.bf16.mxu1 %v8613_v13  ;;  %v7982_v42 = vpack.c.bf16 %v9006_v59, %v9004_v58  ;;  %v2797_v58 = vld [vmem:[%s10011_s1 + $0xe0] sm:$0xff]  ;;  %v2798_v59 = vld [vmem:[%s10011_s1 + $0xe8] sm:$0xff] }
 0x2cd   :  { %7929 = vmatpush3.bf16.msra.mxu1 %v8881_v14  ;;  %6955 = vmatprep.mubr.msk.f32.mxu1 %vm8615_vm1, %v8614_v23  ;;  %v2370_v14 = vand.u32 4294901760, %v9018_v8  ;;  %v2816_v61 = vand.u32 4294901760, %v2797_v58 }
 0x2ce   :  { %7930 = vmatprep.subr.bf16.mxu1 %v8613_v13 }
 0x2cf   :  { %v2371_v27 = vsub.f32 %v9018_v8, %v2370_v14  ;;  %v9164_v8 = vsub.f32 %v2797_v58, %v2816_v61 }
 0x2d1   :  { %7932 = vmatpush3.bf16.msra.mxu1 %v8883_v15  ;;  %v2377_v15 = vand.u32 4294901760, %v9020_v0  ;;  %v2372_v30 = vand.u32 4294901760, %v2371_v27 }
 0x2d2   :  { %7933 = vmatprep.subr.bf16.mxu1 %v8613_v13 }
 0x2d3   :  { %v2378_v28 = vsub.f32 %v9020_v0, %v2377_v15 }
 0x2d5   :  { %7935 = vmatpush3.bf16.msra.mxu1 %v8885_v16  ;;  %v2237_v16 = vld [vmem:[%s10011_s1 + $0xc0] sm:$0xff]  ;;  %v2379_v31 = vand.u32 4294901760, %v2378_v28 }
 0x2d6   :  { %7936 = vmatprep.subr.bf16.mxu1 %v8613_v13  ;;  %v9028_v25 = vand.u32 4294901760, %v2237_v16 }
 0x2d7   :  { %v7973_v12 = vpack.c.bf16 %v2379_v31, %v2372_v30 }
 0x2d8   :  { %v9039_v29 = vsub.f32 %v2237_v16, %v9028_v25 }
 0x2d9   :  { %7938 = vmatpush3.bf16.msra.mxu1 %v8887_v17  ;;  %v7970_v17 = vpack.c.bf16 %v2365_v45, %v2358_v9 }
 0x2da   :  { %6953 = vmatprep.subr.mxu1 %v8614_v23  ;;  %v2384_v11 = vand.u32 4294901760, %v9039_v29 }
 0x2dc   :  { %v2385_v18 = vsub.f32 %v9039_v29, %v2384_v11 }
 0x2dd   :  { %6954 = vmatpush3.msra.mxu1 %v1818_v47  ;;  %v8009_v47 = vpack.c.bf16 %v2377_v15, %v2370_v14 }
 0x2de   :  { %6956 = vmatmul.mubr.f32.vlgmr.msra.gmra.mrb[8].mxu1 %v8925_v37  ;;  %7939 = vmatprep.subr.bf16.mxu1 %v8613_v13  ;;  %v2386_v36 = vand.u32 4294901760, %v2385_v18 }
 0x2df   :  { %7941 = vmatpush3.bf16.msra.mxu1 %v8794_v10  ;;  %6976 = vmatprep.mubr.msk.f32.mxu1 %vm8615_vm1, %v8614_v23  ;;  %v2231_v10 = vld [vmem:[%s10011_s1 + $0x90] sm:$0xff] }
 0x2e0   :  { %7942 = vmatprep.subr.bf16.mxu1 %v8613_v13 }
 0x2e3   :  { %7944 = vmatpush3.bf16.msra.mxu1 %v8820_v32  ;;  %v2232_v32 = vld [vmem:[%s10011_s1 + $0x98] sm:$0xff] }
 0x2e4   :  { %7945 = vmatprep.subr.bf16.mxu1 %v8613_v13 }
 0x2e7   :  { %7947 = vmatpush3.bf16.msra.mxu1 %v8838_v41  ;;  %v2248_v41 = vand.u32 4294901760, %v2231_v10 }
 0x2e8   :  { %7948 = vmatprep.subr.bf16.mxu1 %v8613_v13 }
 0x2e9   :  { %v8990_v40 = vsub.f32 %v2231_v10, %v2248_v41 }
 0x2eb   :  { %7950 = vmatpush3.bf16.msra.mxu1 %v8842_v39  ;;  %v2251_v39 = vand.u32 4294901760, %v2232_v32  ;;  %v2342_v52 = vand.u32 4294901760, %v8990_v40 }
 0x2ec   :  { %6974 = vmatprep.subr.mxu1 %v8614_v23 }
 0x2ed   :  { %v2343_v56 = vsub.f32 %v8990_v40, %v2342_v52  ;;  %v9043_v35 = vpack.c.bf16 %v2251_v39, %v2248_v41 }
 0x2ef   :  { %6975 = vmatpush3.msra.mxu1 %v8854_v43  ;;  %v8992_v43 = vsub.f32 %v2232_v32, %v2251_v39  ;;  %v2344_v62 = vand.u32 4294901760, %v2343_v56  ;;  %v7976_v39 = vpack.c.bf16 %v8909_v21, %v8904_v20  ;;  %v2794_v20 = vld [vmem:[%s10011_s1 + $0xc8] sm:$0xff]  ;;  %v2795_v21 = vld [vmem:[%s10011_s1 + $0xd0] sm:$0xff] }
 0x2f0   :  { %6977 = vmatmul.mubr.f32.vlgmr.msra.gmra.mrb[8].mxu1 %v8925_v37  ;;  %7951 = vmatprep.subr.bf16.mxu1 %v8613_v13  ;;  %v9058_v37 = vpack.c.bf16 %v2263_v4, %v2260_v3  ;;  %v2825_v4 = vand.u32 4294901760, %v2800_v1 }
 0x2f1   :  { %6997 = vmatprep.mubr.msk.f32.mxu1 %vm8615_vm1, %v8614_v23  ;;  %v2349_v53 = vand.u32 4294901760, %v8992_v43  ;;  %7953 = vmatpush3.bf16.msra.mxu1 %v9034_v26  ;;  %v7979_v38 = vpack.c.bf16 %v8992_v43, %v8990_v40 }
 0x2f2   :  { %7954 = vmatprep.subr.bf16.mxu1 %v8613_v13  ;;  %v9170_v45 = vsub.f32 %v2800_v1, %v2825_v4 }
 0x2f3   :  { %v2350_v57 = vsub.f32 %v8992_v43, %v2349_v53  ;;  %v8003_v44 = vpack.c.bf16 %v2349_v53, %v2342_v52  ;;  %v8000_v53 = vpack.c.bf16 %v2335_v24, %v2328_v22  ;;  %v2807_v22 = vand.u32 4294901760, %v2794_v20 }
 0x2f4   :  { %v2810_v24 = vand.u32 4294901760, %v2795_v21 }
 0x2f5   :  { %v2351_v63 = vand.u32 4294901760, %v2350_v57  ;;  %7956 = vmatpush3.bf16.msra.mxu1 %v9043_v35  ;;  %v9136_v55 = vsub.f32 %v2794_v20, %v2807_v22  ;;  %v2796_v57 = vld [vmem:[%s10011_s1 + $0xd8] sm:$0xff] }
 0x2f6   :  { %7957 = vmatprep.subr.bf16.mxu1 %v8613_v13  ;;  %v9134_v54 = vpack.c.bf16 %v2810_v24, %v2807_v22  ;;  %v9138_v56 = vsub.f32 %v2795_v21, %v2810_v24  ;;  %v2813_v60 = vand.u32 4294901760, %v2796_v57 }
 0x2f7   :  { %v7967_v5 = vpack.c.bf16 %v2351_v63, %v2344_v62  ;;  %v2799_v62 = vld [vmem:[%s10011_s1 + $0xf0] sm:$0xff]  ;;  %v2819_v63 = vand.u32 4294901760, %v2798_v59 }
 0x2f8   :  { %v2822_v3 = vand.u32 4294901760, %v2799_v62  ;;  %v9160_v6 = vpack.c.bf16 %v2816_v61, %v2813_v60  ;;  %v9162_v7 = vsub.f32 %v2796_v57, %v2813_v60 }
 0x2f9   :  { %7968 = vmatpush3.bf16.msra.mxu0 %v7967_v5  ;;  %7959 = vmatpush3.bf16.msra.mxu1 %v9051_v19  ;;  %v2828_v5 = vand.u32 4294901760, %v2801_v2  ;;  %v9166_v0 = vsub.f32 %v2798_v59, %v2819_v63 }
 0x2fa   :  { %7969 = vmatprep.subr.bf16.mxu0 %v8613_v13  ;;  %7960 = vmatprep.subr.bf16.mxu1 %v8613_v13  ;;  %v9168_v9 = vsub.f32 %v2799_v62, %v2822_v3  ;;  %v9173_v14 = vpack.c.bf16 %v2822_v3, %v2819_v63  ;;  %v8051_v20 = vpack.c.bf16 %v9164_v8, %v9162_v7 }
 0x2fb   :  { %v9175_v15 = vsub.f32 %v2801_v2, %v2828_v5  ;;  %v9179_v16 = vpack.c.bf16 %v2828_v5, %v2825_v4 }
 0x2fc   :  { %v8054_v21 = vpack.c.bf16 %v9168_v9, %v9166_v0 }
 0x2fd   :  { %7971 = vmatpush3.bf16.msra.mxu0 %v7970_v17  ;;  %7962 = vmatpush3.bf16.msra.mxu1 %v9058_v37  ;;  %v2802_v17 = vld [vmem:[%s10011_s1 + $0x108] sm:$0xff]  ;;  %v8057_v22 = vpack.c.bf16 %v9175_v15, %v9170_v45 }
 0x2fe   :  { %7972 = vmatprep.subr.bf16.mxu0 %v8613_v13  ;;  %6995 = vmatprep.subr.mxu1 %v8614_v23  ;;  %v9188_v27 = vand.u32 4294901760, %v2802_v17 }
 0x301   :  { %7974 = vmatpush3.bf16.msra.mxu0 %v7973_v12  ;;  %6996 = vmatpush3.msra.mxu1 %v9028_v25 }
 0x302   :  { %7016 = vmatprep.subr.mxu0 %v8614_v23  ;;  %8023 = vmatprep.subr.bf16.mxu1 %v8613_v13 }
 0x305   :  { %7017 = vmatpush3.msra.mxu0 %v2386_v36 }
 0x306   :  { %7975 = vmatprep.subr.bf16.mxu0 %v8613_v13 }
 0x3c3   :  { %v9070_v48 = vpop.f32.mrb[8].mxu1 }
 0x3c4   :  { %v2225_v49 = vmax.f32 %v9070_v48, 0.0  ;;  %v6978_v10 = vpop.f32.mrb[9].mxu1 }
 0x3c6   :  { %2227 = vst.msk [vmem:[#allocation2] sm:$0xff] %vm2226_vm9, %v2225_v49 }
 0x3cd   :  { %v2228_v32 = vld [vmem:[#allocation2] sm:$0xff] }
 0x3ce   :  { %v2239_v41 = vsel %vm1640_vm4, %v2228_v32, 0  ;;  %v2935_v32 = vand.u32 4294901760, %v9170_v45 }
 0x3cf   :  { %v2315_v40 = vand.u32 4294901760, %v2239_v41 }
 0x3d1   :  { %v2316_v43 = vsub.f32 %v2239_v41, %v2315_v40  ;;  %7019 = vmatmul.mubr.f32.vlgmr.msra.gmra.mrb[6].mxu0 %v2315_v40  ;;  %v2942_v41 = vand.u32 4294901760, %v9175_v15 }
 0x3d2   :  { %7977 = vmatpush3.bf16.msra.mxu0 %v7976_v39  ;;  %7039 = vmatprep.mubr.msk.f32.mxu0 %vm8615_vm1, %v8614_v23 }
 0x3d3   :  { %7978 = vmatprep.subr.bf16.mxu0 %v8613_v13  ;;  %v2317_v50 = vand.u32 4294901760, %v2316_v43  ;;  %v8081_v61 = vpack.c.bf16 %v2942_v41, %v2935_v32 }
 0x3d5   :  { %v2318_v51 = vsub.f32 %v2316_v43, %v2317_v50 }
 0x3d6   :  { %7980 = vmatpush3.bf16.msra.mxu0 %v7979_v38  ;;  %v2921_v38 = vand.u32 4294901760, %v9166_v0 }
 0x3d7   :  { %7981 = vmatprep.subr.bf16.mxu0 %v8613_v13  ;;  %v2319_v52 = vand.u32 4294901760, %v2318_v51 }
 0x3d9   :  { %6998 = vmatmul.mubr.f32.vlgmr.msra.gmra.mrb[10].mxu1 %v2319_v52 }
 0x3da   :  { %7983 = vmatpush3.bf16.msra.mxu0 %v7982_v42  ;;  %7123 = vmatprep.mubr.msk.f32.mxu1 %vm8615_vm1, %v8614_v23  ;;  %v2928_v42 = vand.u32 4294901760, %v9168_v9 }
 0x3db   :  { %7984 = vmatprep.subr.bf16.mxu0 %v8613_v13  ;;  %8025 = vmatpush3.bf16.msra.mxu1 %v9134_v54 }
 0x3dc   :  { %8026 = vmatprep.subr.bf16.mxu1 %v8613_v13  ;;  %v8078_v60 = vpack.c.bf16 %v2928_v42, %v2921_v38 }
 0x3de   :  { %7986 = vmatpush3.bf16.msra.mxu0 %v7985_v33 }
 0x3df   :  { %7037 = vmatprep.subr.mxu0 %v8614_v23  ;;  %8028 = vmatpush3.bf16.msra.mxu1 %v9160_v6 }
 0x3e0   :  { %8029 = vmatprep.subr.bf16.mxu1 %v8613_v13 }
 0x3e2   :  { %7038 = vmatpush3.msra.mxu0 %v9039_v29 }
 0x3e3   :  { %7040 = vmatmul.mubr.f32.vlgmr.msra.gmra.mrb[6].mxu0 %v2316_v43  ;;  %7987 = vmatprep.subr.bf16.mxu0 %v8613_v13  ;;  %v2943_v43 = vsub.f32 %v9175_v15, %v2942_v41 }
 0x3e4   :  { %7989 = vmatpush3.bf16.msra.mxu0 %v9034_v26  ;;  %7060 = vmatprep.mubr.msk.f32.mxu0 %vm8615_vm1, %v8614_v23 }
 0x3e5   :  { %7990 = vmatprep.subr.bf16.mxu0 %v8613_v13  ;;  %8031 = vmatpush3.bf16.msra.mxu1 %v9173_v14  ;;  %v2944_v51 = vand.u32 4294901760, %v2943_v43 }
 0x3e6   :  { %8032 = vmatprep.subr.bf16.mxu1 %v8613_v13 }
 0x3e8   :  { %7992 = vmatpush3.bf16.msra.mxu0 %v9043_v35 }
 0x3e9   :  { %7993 = vmatprep.subr.bf16.mxu0 %v8613_v13  ;;  %8034 = vmatpush3.bf16.msra.mxu1 %v9179_v16 }
 0x3ea   :  { %7121 = vmatprep.subr.mxu1 %v8614_v23 }
 0x3ec   :  { %7995 = vmatpush3.bf16.msra.mxu0 %v9051_v19 }
 0x3ed   :  { %7996 = vmatprep.subr.bf16.mxu0 %v8613_v13  ;;  %7122 = vmatpush3.msra.mxu1 %v9188_v27 }
 0x3ee   :  { %8035 = vmatprep.subr.bf16.mxu1 %v8613_v13 }
 0x3f0   :  { %7998 = vmatpush3.bf16.msra.mxu0 %v9058_v37 }
 0x3f1   :  { %7058 = vmatprep.subr.mxu0 %v8614_v23 }
 0x3f4   :  { %7059 = vmatpush3.msra.mxu0 %v9028_v25 }
 0x3f5   :  { %7061 = vmatmul.mubr.f32.vlgmr.msra.gmra.mrb[6].mxu0 %v2317_v50  ;;  %7999 = vmatprep.subr.bf16.mxu0 %v8613_v13 }
 0x3f6   :  { %8001 = vmatpush3.bf16.msra.mxu0 %v8000_v53  ;;  %7081 = vmatprep.mubr.msk.f32.mxu0 %vm8615_vm1, %v8614_v23  ;;  %v8048_v53 = vpack.c.bf16 %v9138_v56, %v9136_v55 }
 0x3f7   :  { %8002 = vmatprep.subr.bf16.mxu0 %v8613_v13 }
 0x3fa   :  { %8004 = vmatpush3.bf16.msra.mxu0 %v8003_v44  ;;  %v2922_v44 = vsub.f32 %v9166_v0, %v2921_v38  ;;  %v2948_v0 = vsub.f32 %v2802_v17, %v9188_v27 }
 0x3fb   :  { %8005 = vmatprep.subr.bf16.mxu0 %v8613_v13 }
 0x3fe   :  { %8007 = vmatpush3.bf16.msra.mxu0 %v8006_v46  ;;  %v2929_v46 = vsub.f32 %v9168_v9, %v2928_v42  ;;  %v2949_v9 = vand.u32 4294901760, %v2948_v0 }
 0x3ff   :  { %8008 = vmatprep.subr.bf16.mxu0 %v8613_v13 }
 0x400   :  { %v2930_v10 = vand.u32 4294901760, %v2929_v46 }
 0x402   :  { %8010 = vmatpush3.bf16.msra.mxu0 %v8009_v47  ;;  %v2923_v47 = vand.u32 4294901760, %v2922_v44 }
 0x403   :  { %7079 = vmatprep.subr.mxu0 %v8614_v23 }
 0x404   :  { %v8042_v39 = vpack.c.bf16 %v2930_v10, %v2923_v47 }
 0x406   :  { %7080 = vmatpush3.msra.mxu0 %v2384_v11  ;;  %v2914_v11 = vand.u32 4294901760, %v9164_v8 }
 0x407   :  { %7082 = vmatmul.mubr.f32.vlgmr.msra.gmra.mrb[6].mxu0 %v2315_v40  ;;  %8011 = vmatprep.subr.bf16.mxu0 %v8613_v13 }
 0x408   :  { %8013 = vmatpush3.bf16.msra.mxu0 %v9034_v26  ;;  %7102 = vmatprep.mubr.msk.f32.mxu0 %vm8615_vm1, %v8614_v23  ;;  %v2900_v26 = vand.u32 4294901760, %v9138_v56 }
 0x409   :  { %8014 = vmatprep.subr.bf16.mxu0 %v8613_v13 }
 0x40a   :  { %v2901_v29 = vsub.f32 %v9138_v56, %v2900_v26 }
 0x40c   :  { %8016 = vmatpush3.bf16.msra.mxu0 %v9043_v35  ;;  %v2902_v31 = vand.u32 4294901760, %v2901_v29  ;;  %v2907_v35 = vand.u32 4294901760, %v9162_v7  ;;  %v3364_v29 = vld [vmem:[%s10011_s1 + $0x130] sm:$0xff] }
 0x40d   :  { %8017 = vmatprep.subr.bf16.mxu0 %v8613_v13 }
 0x40e   :  { %v2908_v18 = vsub.f32 %v9162_v7, %v2907_v35  ;;  %v8075_v59 = vpack.c.bf16 %v2914_v11, %v2907_v35  ;;  %v3365_v35 = vld [vmem:[%s10011_s1 + $0x138] sm:$0xff] }
 0x410   :  { %8019 = vmatpush3.bf16.msra.mxu0 %v9051_v19  ;;  %v2915_v19 = vsub.f32 %v9164_v8, %v2914_v11  ;;  %v2909_v36 = vand.u32 4294901760, %v2908_v18  ;;  %v3385_v11 = vand.u32 4294901760, %v3364_v29  ;;  %v3367_v18 = vld [vmem:[%s10011_s1 + $0x148] sm:$0xff] }
 0x411   :  { %8020 = vmatprep.subr.bf16.mxu0 %v8613_v13 }
 0x412   :  { %v9314_v44 = vsub.f32 %v3364_v29, %v3385_v11 }
 0x414   :  { %8022 = vmatpush3.bf16.msra.mxu0 %v9058_v37  ;;  %v2916_v37 = vand.u32 4294901760, %v2915_v19  ;;  %v3388_v19 = vand.u32 4294901760, %v3365_v35 }
 0x415   :  { %7100 = vmatprep.subr.mxu0 %v8614_v23 }
 0x416   :  { %v8039_v33 = vpack.c.bf16 %v2916_v37, %v2909_v36  ;;  %v3394_v37 = vand.u32 4294901760, %v3367_v18  ;;  %v9316_v46 = vsub.f32 %v3365_v35, %v3388_v19  ;;  %v9321_v10 = vpack.c.bf16 %v3388_v19, %v3385_v11 }
 0x418   :  { %7101 = vmatpush3.msra.mxu0 %v9028_v25  ;;  %v2893_v25 = vand.u32 4294901760, %v9136_v55 }
 0x419   :  { %7103 = vmatmul.mubr.f32.vlgmr.msra.gmra.mrb[6].mxu0 %v2315_v40  ;;  %8095 = vmatprep.subr.bf16.mxu0 %v8613_v13  ;;  %v2936_v40 = vsub.f32 %v9170_v45, %v2935_v32  ;;  %v2950_v45 = vsub.f32 %v2948_v0, %v2949_v9  ;;  %v9323_v32 = vsub.f32 %v3367_v18, %v3394_v37 }
 0x41a   :  { %7249 = vmatprep.mubr.msk.f32.mxu0 %vm8615_vm1, %v8614_v23  ;;  %v2894_v28 = vsub.f32 %v9136_v55, %v2893_v25  ;;  %v8072_v58 = vpack.c.bf16 %v2900_v26, %v2893_v25 }
 0x41b   :  { %v2937_v50 = vand.u32 4294901760, %v2936_v40  ;;  %v2951_v15 = vand.u32 4294901760, %v2950_v45 }
 0x41c   :  { %v2895_v30 = vand.u32 4294901760, %v2894_v28  ;;  %v3363_v28 = vld [vmem:[%s10011_s1 + $0x128] sm:$0xff] }
 0x41d   :  { %v8045_v52 = vpack.c.bf16 %v2944_v51, %v2937_v50 }
 0x41e   :  { %v8036_v12 = vpack.c.bf16 %v2902_v31, %v2895_v30  ;;  %v3382_v31 = vand.u32 4294901760, %v3363_v28 }
 0x4ac   :  { %v2321_v24 = vpop.f32.mrb[10].mxu1 }
 0x4ad   :  { %v6999_v57 = vpop.f32.mrb[11].mxu1 }
 0x4ec   :  { %v2787_v62 = vpop.f32.mrb[6].mxu0 }
 0x4ed   :  { %v9215_v63 = vadd.f32 %v2787_v62, %v2321_v24  ;;  %v7104_v1 = vpop.f32.mrb[7].mxu0  ;;  %v3494_v62 = vand.u32 4294901760, %v9316_v46 }
 0x4ef   :  { %v2791_v55 = vmax.f32 %v9215_v63, 0.0 }
 0x4f1   :  { %2792 = vst.msk [vmem:[#allocation2] sm:$0xff] %vm615_vm14, %v2791_v55 }
 0x4f8   :  { %v2793_v56 = vld [vmem:[#allocation2] sm:$0xff] }
 0x4f9   :  { %v2804_v2 = vsel %vm1640_vm4, %v2793_v56, 0 }
 0x4fa   :  { %v9222_v3 = vand.u32 4294901760, %v2804_v2 }
 0x4fc   :  { %v2881_v4 = vsub.f32 %v2804_v2, %v9222_v3  ;;  %v3495_v2 = vsub.f32 %v9316_v46, %v3494_v62 }
 0x4fe   :  { %v2882_v5 = vand.u32 4294901760, %v2881_v4 }
 0x500   :  { %v2883_v7 = vsub.f32 %v2881_v4, %v2882_v5 }
 0x502   :  { %v2884_v8 = vand.u32 4294901760, %v2883_v7  ;;  %v3508_v7 = vand.u32 4294901760, %v9323_v32 }
 0x504   :  { %7124 = vmatmul.mubr.f32.vlgmr.msra.gmra.mrb[12].mxu1 %v2884_v8 }
 0x505   :  { %8037 = vmatpush3.bf16.msra.mxu1 %v8036_v12  ;;  %7144 = vmatprep.mubr.msk.f32.mxu1 %vm8615_vm1, %v8614_v23  ;;  %v3366_v12 = vld [vmem:[%s10011_s1 + $0x140] sm:$0xff] }
 0x506   :  { %8038 = vmatprep.subr.bf16.mxu1 %v8613_v13  ;;  %v3391_v36 = vand.u32 4294901760, %v3366_v12 }
 0x508   :  { %v9318_v47 = vsub.f32 %v3366_v12, %v3391_v36  ;;  %v9327_v41 = vpack.c.bf16 %v3394_v37, %v3391_v36 }
 0x509   :  { %8040 = vmatpush3.bf16.msra.mxu1 %v8039_v33  ;;  %v9312_v33 = vsub.f32 %v3363_v28, %v3382_v31 }
 0x50a   :  { %8041 = vmatprep.subr.bf16.mxu1 %v8613_v13 }
 0x50d   :  { %8043 = vmatpush3.bf16.msra.mxu1 %v8042_v39  ;;  %v3368_v39 = vld [vmem:[%s10011_s1 + $0x150] sm:$0xff] }
 0x50e   :  { %8044 = vmatprep.subr.bf16.mxu1 %v8613_v13  ;;  %v9336_v50 = vand.u32 4294901760, %v3368_v39 }
 0x511   :  { %8046 = vmatpush3.bf16.msra.mxu1 %v8045_v52 }
 0x512   :  { %7142 = vmatprep.subr.mxu1 %v8614_v23 }
 0x515   :  { %7143 = vmatpush3.msra.mxu1 %v2951_v15 }
 0x516   :  { %7145 = vmatmul.mubr.f32.vlgmr.msra.gmra.mrb[12].mxu1 %v9222_v3  ;;  %8047 = vmatprep.subr.bf16.mxu1 %v8613_v13 }
 0x517   :  { %8049 = vmatpush3.bf16.msra.mxu1 %v8048_v53  ;;  %7165 = vmatprep.mubr.msk.f32.mxu1 %vm8615_vm1, %v8614_v23 }
 0x518   :  { %8050 = vmatprep.subr.bf16.mxu1 %v8613_v13 }
 0x51b   :  { %8052 = vmatpush3.bf16.msra.mxu1 %v8051_v20 }
 0x51c   :  { %8053 = vmatprep.subr.bf16.mxu1 %v8613_v13 }
 0x51f   :  { %8055 = vmatpush3.bf16.msra.mxu1 %v8054_v21 }
 0x520   :  { %8056 = vmatprep.subr.bf16.mxu1 %v8613_v13 }
 0x523   :  { %8058 = vmatpush3.bf16.msra.mxu1 %v8057_v22  ;;  %v3480_v22 = vand.u32 4294901760, %v9312_v33 }
 0x524   :  { %7163 = vmatprep.subr.mxu1 %v8614_v23 }
 0x527   :  { %7164 = vmatpush3.msra.mxu1 %v2948_v0 }
 0x528   :  { %7166 = vmatmul.mubr.f32.vlgmr.msra.gmra.mrb[12].mxu1 %v2881_v4  ;;  %8059 = vmatprep.subr.bf16.mxu1 %v8613_v13  ;;  %v3496_v4 = vand.u32 4294901760, %v3495_v2 }
 0x529   :  { %8061 = vmatpush3.bf16.msra.mxu1 %v9134_v54  ;;  %7186 = vmatprep.mubr.msk.f32.mxu1 %vm8615_vm1, %v8614_v23 }
 0x52a   :  { %8062 = vmatprep.subr.bf16.mxu1 %v8613_v13 }
 0x52d   :  { %8064 = vmatpush3.bf16.msra.mxu1 %v9160_v6 }
 0x52e   :  { %8065 = vmatprep.subr.bf16.mxu1 %v8613_v13 }
 0x531   :  { %8067 = vmatpush3.bf16.msra.mxu1 %v9173_v14 }
 0x532   :  { %8068 = vmatprep.subr.bf16.mxu1 %v8613_v13 }
 0x535   :  { %8070 = vmatpush3.bf16.msra.mxu1 %v9179_v16 }
 0x536   :  { %7184 = vmatprep.subr.mxu1 %v8614_v23 }
 0x539   :  { %7185 = vmatpush3.msra.mxu1 %v9188_v27 }
 0x53a   :  { %7187 = vmatmul.mubr.f32.vlgmr.msra.gmra.mrb[12].mxu1 %v2882_v5  ;;  %8071 = vmatprep.subr.bf16.mxu1 %v8613_v13  ;;  %v3501_v5 = vand.u32 4294901760, %v9318_v47 }
 0x53b   :  { %8073 = vmatpush3.bf16.msra.mxu1 %v8072_v58  ;;  %7207 = vmatprep.mubr.msk.f32.mxu1 %vm8615_vm1, %v8614_v23  ;;  %v3481_v58 = vsub.f32 %v9312_v33, %v3480_v22 }
 0x53c   :  { %8074 = vmatprep.subr.bf16.mxu1 %v8613_v13  ;;  %v3502_v0 = vsub.f32 %v9318_v47, %v3501_v5 }
 0x53e   :  { %v3503_v45 = vand.u32 4294901760, %v3502_v0 }
 0x53f   :  { %8076 = vmatpush3.bf16.msra.mxu1 %v8075_v59 }
 0x540   :  { %8077 = vmatprep.subr.bf16.mxu1 %v8613_v13 }
 0x543   :  { %8079 = vmatpush3.bf16.msra.mxu1 %v8078_v60  ;;  %v3482_v60 = vand.u32 4294901760, %v3481_v58 }
 0x544   :  { %8080 = vmatprep.subr.bf16.mxu1 %v8613_v13 }
 0x547   :  { %8082 = vmatpush3.bf16.msra.mxu1 %v8081_v61  ;;  %v3487_v61 = vand.u32 4294901760, %v9314_v44 }
 0x548   :  { %7205 = vmatprep.subr.mxu1 %v8614_v23 }
 0x549   :  { %v3488_v56 = vsub.f32 %v9314_v44, %v3487_v61 }
 0x54b   :  { %7206 = vmatpush3.msra.mxu1 %v2949_v9  ;;  %v3509_v9 = vsub.f32 %v9323_v32, %v3508_v7 }
 0x54c   :  { %7208 = vmatmul.mubr.f32.vlgmr.msra.gmra.mrb[12].mxu1 %v9222_v3  ;;  %8083 = vmatprep.subr.bf16.mxu1 %v8613_v13 }
 0x54d   :  { %8085 = vmatpush3.bf16.msra.mxu1 %v9134_v54  ;;  %7228 = vmatprep.mubr.msk.f32.mxu1 %vm8615_vm1, %v8614_v23  ;;  %v3360_v54 = vld [vmem:[%s10011_s1 + $0x110] sm:$0xff]  ;;  %v3510_v15 = vand.u32 4294901760, %v3509_v9 }
 0x54e   :  { %8086 = vmatprep.subr.bf16.mxu1 %v8613_v13 }
 0x551   :  { %8088 = vmatpush3.bf16.msra.mxu1 %v9160_v6  ;;  %v3361_v6 = vld [vmem:[%s10011_s1 + $0x118] sm:$0xff] }
 0x552   :  { %8089 = vmatprep.subr.bf16.mxu1 %v8613_v13 }
 0x555   :  { %8091 = vmatpush3.bf16.msra.mxu1 %v9173_v14  ;;  %v3373_v14 = vand.u32 4294901760, %v3360_v54 }
 0x556   :  { %8092 = vmatprep.subr.bf16.mxu1 %v8613_v13 }
 0x557   :  { %v9284_v25 = vsub.f32 %v3360_v54, %v3373_v14  ;;  %v8117_v54 = vpack.c.bf16 %v3510_v15, %v3503_v45 }
 0x559   :  { %8094 = vmatpush3.bf16.msra.mxu1 %v9179_v16  ;;  %v3376_v16 = vand.u32 4294901760, %v3361_v6  ;;  %v3459_v40 = vand.u32 4294901760, %v9284_v25 }
 0x55a   :  { %7226 = vmatprep.subr.mxu1 %v8614_v23 }
 0x55b   :  { %v9282_v17 = vpack.c.bf16 %v3376_v16, %v3373_v14  ;;  %v9286_v26 = vsub.f32 %v3361_v6, %v3376_v16  ;;  %v3460_v51 = vsub.f32 %v9284_v25, %v3459_v40  ;;  %v8126_v16 = vpack.c.bf16 %v9316_v46, %v9314_v44 }
 0x55d   :  { %7227 = vmatpush3.msra.mxu1 %v9188_v27  ;;  %v3362_v27 = vld [vmem:[%s10011_s1 + $0x120] sm:$0xff]  ;;  %8097 = vmatpush3.bf16.msra.mxu0 %v9282_v17  ;;  %v3466_v43 = vand.u32 4294901760, %v9286_v26  ;;  %v3461_v53 = vand.u32 4294901760, %v3460_v51  ;;  %v8120_v6 = vpack.c.bf16 %v9286_v26, %v9284_v25  ;;  %v3930_v51 = vld [vmem:[%s10011_s1 + $0x178] sm:$0xff] }
 0x55e   :  { %7229 = vmatmul.mubr.f32.vlgmr.msra.gmra.mrb[12].mxu1 %v9222_v3  ;;  %8167 = vmatprep.subr.bf16.mxu1 %v8613_v13  ;;  %v3379_v30 = vand.u32 4294901760, %v3362_v27  ;;  %v3489_v3 = vand.u32 4294901760, %v3488_v56 }
 0x55f   :  { %7375 = vmatprep.mubr.msk.f32.mxu1 %vm8615_vm1, %v8614_v23  ;;  %8098 = vmatprep.subr.bf16.mxu0 %v8613_v13  ;;  %v3467_v52 = vsub.f32 %v9286_v26, %v3466_v43  ;;  %v8144_v28 = vpack.c.bf16 %v3466_v43, %v3459_v40  ;;  %v3928_v43 = vld [vmem:[%s10011_s1 + $0x168] sm:$0xff] }
 0x560   :  { %v9308_v38 = vpack.c.bf16 %v3382_v31, %v3379_v30  ;;  %v9310_v42 = vsub.f32 %v3362_v27, %v3379_v30  ;;  %v8114_v8 = vpack.c.bf16 %v3496_v4, %v3489_v3  ;;  %v8129_v27 = vpack.c.bf16 %v9323_v32, %v9318_v47 }
 0x561   :  { %v3468_v20 = vand.u32 4294901760, %v3467_v52  ;;  %v8150_v30 = vpack.c.bf16 %v3494_v62, %v3487_v61  ;;  %v8153_v31 = vpack.c.bf16 %v3508_v7, %v3501_v5  ;;  %v3945_v52 = vand.u32 4294901760, %v3928_v43  ;;  %v3934_v7 = vld [vmem:[%s10011_s1 + $0x198] sm:$0xff] }
 0x562   :  { %8100 = vmatpush3.bf16.msra.mxu0 %v9308_v38  ;;  %v3473_v21 = vand.u32 4294901760, %v9310_v42  ;;  %v8123_v14 = vpack.c.bf16 %v9312_v33, %v9310_v42  ;;  %v3514_v33 = vsub.f32 %v3368_v39, %v9336_v50  ;;  %v9484_v9 = vand.u32 4294901760, %v3934_v7 }
 0x563   :  { %8101 = vmatprep.subr.bf16.mxu0 %v8613_v13  ;;  %v8108_v24 = vpack.c.bf16 %v3468_v20, %v3461_v53  ;;  %v3931_v20 = vld [vmem:[%s10011_s1 + $0x180] sm:$0xff]  ;;  %v9458_v61 = vsub.f32 %v3928_v43, %v3945_v52 }
 0x564   :  { %v3474_v57 = vsub.f32 %v9310_v42, %v3473_v21  ;;  %v8147_v29 = vpack.c.bf16 %v3480_v22, %v3473_v21  ;;  %v3515_v44 = vand.u32 4294901760, %v3514_v33  ;;  %v3951_v21 = vand.u32 4294901760, %v3930_v51  ;;  %v3932_v22 = vld [vmem:[%s10011_s1 + $0x188] sm:$0xff] }
 0x565   :  { %v3957_v58 = vand.u32 4294901760, %v3932_v22 }
 0x566   :  { %8103 = vmatpush3.bf16.msra.mxu0 %v9321_v10  ;;  %v3475_v59 = vand.u32 4294901760, %v3474_v57  ;;  %v3516_v46 = vsub.f32 %v3514_v33, %v3515_v44  ;;  %v3954_v57 = vand.u32 4294901760, %v3931_v20 }
 0x567   :  { %8104 = vmatprep.subr.bf16.mxu0 %v8613_v13  ;;  %v9466_v2 = vsub.f32 %v3932_v22, %v3957_v58 }
 0x568   :  { %v8111_v1 = vpack.c.bf16 %v3482_v60, %v3475_v59  ;;  %v3517_v47 = vand.u32 4294901760, %v3516_v46  ;;  %v9464_v56 = vsub.f32 %v3931_v20, %v3954_v57  ;;  %v9469_v3 = vpack.c.bf16 %v3954_v57, %v3951_v21 }
 0x56a   :  { %8106 = vmatpush3.bf16.msra.mxu0 %v9327_v41 }
 0x56b   :  { %7247 = vmatprep.subr.mxu0 %v8614_v23 }
 0x56e   :  { %7248 = vmatpush3.msra.mxu0 %v9336_v50 }
 0x56f   :  { %8107 = vmatprep.subr.bf16.mxu0 %v8613_v13 }
 0x631   :  { %v9363_v35 = vpop.f32.mrb[12].mxu1 }
 0x632   :  { %v3356_v11 = vmax.f32 %v9363_v35, 0.0  ;;  %v7230_v12 = vpop.f32.mrb[13].mxu1 }
 0x634   :  { %3358 = vst.msk [vmem:[#allocation2] sm:$0xff] %vm3357_vm10, %v3356_v11 }
 0x63b   :  { %v3359_v25 = vld [vmem:[#allocation2] sm:$0xff] }
 0x63c   :  { %v3370_v26 = vsel %vm1640_vm4, %v3359_v25, 0  ;;  %v4060_v25 = vand.u32 4294901760, %v9464_v56 }
 0x63d   :  { %v9370_v18 = vand.u32 4294901760, %v3370_v26 }
 0x63f   :  { %v3447_v19 = vsub.f32 %v3370_v26, %v9370_v18 }
 0x641   :  { %v3448_v36 = vand.u32 4294901760, %v3447_v19 }
 0x643   :  { %v3449_v37 = vsub.f32 %v3447_v19, %v3448_v36 }
 0x645   :  { %v3450_v42 = vand.u32 4294901760, %v3449_v37 }
 0x647   :  { %7250 = vmatmul.mubr.f32.vlgmr.msra.gmra.mrb[8].mxu0 %v3450_v42  ;;  %v4067_v42 = vand.u32 4294901760, %v9466_v2 }
 0x648   :  { %8109 = vmatpush3.bf16.msra.mxu0 %v8108_v24  ;;  %7270 = vmatprep.mubr.msk.f32.mxu0 %vm8615_vm1, %v8614_v23  ;;  %v3933_v24 = vld [vmem:[%s10011_s1 + $0x190] sm:$0xff] }
 0x649   :  { %8110 = vmatprep.subr.bf16.mxu0 %v8613_v13  ;;  %v3960_v59 = vand.u32 4294901760, %v3933_v24  ;;  %v4068_v46 = vsub.f32 %v9466_v2, %v4067_v42 }
 0x64b   :  { %v9471_v4 = vsub.f32 %v3933_v24, %v3960_v59  ;;  %v9475_v5 = vpack.c.bf16 %v3960_v59, %v3957_v58 }
 0x64c   :  { %8112 = vmatpush3.bf16.msra.mxu0 %v8111_v1  ;;  %v9462_v1 = vsub.f32 %v3930_v51, %v3951_v21 }
 0x64d   :  { %8113 = vmatprep.subr.bf16.mxu0 %v8613_v13  ;;  %v8201_v51 = vpack.c.bf16 %v9471_v4, %v9466_v2  ;;  %v4080_v2 = vsub.f32 %v3934_v7, %v9484_v9 }
 0x64e   :  { %v4053_v12 = vand.u32 4294901760, %v9462_v1 }
 0x64f   :  { %v4081_v35 = vand.u32 4294901760, %v4080_v2 }
 0x650   :  { %8115 = vmatpush3.bf16.msra.mxu0 %v8114_v8  ;;  %v8222_v20 = vpack.c.bf16 %v4060_v25, %v4053_v12 }
 0x651   :  { %8116 = vmatprep.subr.bf16.mxu0 %v8613_v13 }
 0x654   :  { %8118 = vmatpush3.bf16.msra.mxu0 %v8117_v54 }
 0x655   :  { %7268 = vmatprep.subr.mxu0 %v8614_v23 }
 0x658   :  { %7269 = vmatpush3.msra.mxu0 %v3517_v47 }
 0x659   :  { %7271 = vmatmul.mubr.f32.vlgmr.msra.gmra.mrb[8].mxu0 %v9370_v18  ;;  %8119 = vmatprep.subr.bf16.mxu0 %v8613_v13 }
 0x65a   :  { %8121 = vmatpush3.bf16.msra.mxu0 %v8120_v6  ;;  %7291 = vmatprep.mubr.msk.f32.mxu0 %vm8615_vm1, %v8614_v23 }
 0x65b   :  { %8122 = vmatprep.subr.bf16.mxu0 %v8613_v13 }
 0x65e   :  { %8124 = vmatpush3.bf16.msra.mxu0 %v8123_v14  ;;  %v4039_v14 = vand.u32 4294901760, %v9458_v61 }
 0x65f   :  { %8125 = vmatprep.subr.bf16.mxu0 %v8613_v13 }
 0x662   :  { %8127 = vmatpush3.bf16.msra.mxu0 %v8126_v16 }
 0x663   :  { %8128 = vmatprep.subr.bf16.mxu0 %v8613_v13 }
 0x666   :  { %8130 = vmatpush3.bf16.msra.mxu0 %v8129_v27 }
 0x667   :  { %7289 = vmatprep.subr.mxu0 %v8614_v23 }
 0x66a   :  { %7290 = vmatpush3.msra.mxu0 %v3514_v33  ;;  %v4074_v33 = vand.u32 4294901760, %v9471_v4 }
 0x66b   :  { %7292 = vmatmul.mubr.f32.vlgmr.msra.gmra.mrb[8].mxu0 %v3447_v19  ;;  %8131 = vmatprep.subr.bf16.mxu0 %v8613_v13  ;;  %v4061_v19 = vsub.f32 %v9464_v56, %v4060_v25 }
 0x66c   :  { %8133 = vmatpush3.bf16.msra.mxu0 %v9282_v17  ;;  %7312 = vmatprep.mubr.msk.f32.mxu0 %vm8615_vm1, %v8614_v23  ;;  %v4075_v47 = vsub.f32 %v9471_v4, %v4074_v33  ;;  %v8225_v21 = vpack.c.bf16 %v4074_v33, %v4067_v42 }
 0x66d   :  { %8134 = vmatprep.subr.bf16.mxu0 %v8613_v13  ;;  %v4062_v37 = vand.u32 4294901760, %v4061_v19 }
 0x670   :  { %8136 = vmatpush3.bf16.msra.mxu0 %v9308_v38 }
 0x671   :  { %8137 = vmatprep.subr.bf16.mxu0 %v8613_v13 }
 0x674   :  { %8139 = vmatpush3.bf16.msra.mxu0 %v9321_v10 }
 0x675   :  { %8140 = vmatprep.subr.bf16.mxu0 %v8613_v13 }
 0x678   :  { %8142 = vmatpush3.bf16.msra.mxu0 %v9327_v41 }
 0x679   :  { %7310 = vmatprep.subr.mxu0 %v8614_v23 }
 0x67c   :  { %7311 = vmatpush3.msra.mxu0 %v9336_v50 }
 0x67d   :  { %7313 = vmatmul.mubr.f32.vlgmr.msra.gmra.mrb[8].mxu0 %v3448_v36  ;;  %8143 = vmatprep.subr.bf16.mxu0 %v8613_v13 }
 0x67e   :  { %8145 = vmatpush3.bf16.msra.mxu0 %v8144_v28  ;;  %7333 = vmatprep.mubr.msk.f32.mxu0 %vm8615_vm1, %v8614_v23  ;;  %v4040_v28 = vsub.f32 %v9458_v61, %v4039_v14 }
 0x67f   :  { %8146 = vmatprep.subr.bf16.mxu0 %v8613_v13 }
 0x682   :  { %8148 = vmatpush3.bf16.msra.mxu0 %v8147_v29 }
 0x683   :  { %8149 = vmatprep.subr.bf16.mxu0 %v8613_v13 }
 0x686   :  { %8151 = vmatpush3.bf16.msra.mxu0 %v8150_v30  ;;  %v4041_v30 = vand.u32 4294901760, %v4040_v28  ;;  %v4499_v28 = vld [vmem:[%s10011_s1 + $0x1d8] sm:$0xff] }
 0x687   :  { %8152 = vmatprep.subr.bf16.mxu0 %v8613_v13 }
 0x68a   :  { %8154 = vmatpush3.bf16.msra.mxu0 %v8153_v31 }
 0x68b   :  { %7331 = vmatprep.subr.mxu0 %v8614_v23 }
 0x68e   :  { %7332 = vmatpush3.msra.mxu0 %v3515_v44 }
 0x68f   :  { %7334 = vmatmul.mubr.f32.vlgmr.msra.gmra.mrb[8].mxu0 %v9370_v18  ;;  %8155 = vmatprep.subr.bf16.mxu0 %v8613_v13 }
 0x690   :  { %8157 = vmatpush3.bf16.msra.mxu0 %v9282_v17  ;;  %7354 = vmatprep.mubr.msk.f32.mxu0 %vm8615_vm1, %v8614_v23  ;;  %v3926_v17 = vld [vmem:[%s10011_s1 + $0x158] sm:$0xff] }
 0x691   :  { %8158 = vmatprep.subr.bf16.mxu0 %v8613_v13 }
 0x694   :  { %8160 = vmatpush3.bf16.msra.mxu0 %v9308_v38  ;;  %v3927_v38 = vld [vmem:[%s10011_s1 + $0x160] sm:$0xff] }
 0x695   :  { %8161 = vmatprep.subr.bf16.mxu0 %v8613_v13  ;;  %v3942_v32 = vand.u32 4294901760, %v3927_v38 }
 0x697   :  { %v9434_v40 = vsub.f32 %v3927_v38, %v3942_v32  ;;  %v4076_v38 = vand.u32 4294901760, %v4075_v47 }
 0x698   :  { %8163 = vmatpush3.bf16.msra.mxu0 %v9321_v10  ;;  %v3939_v10 = vand.u32 4294901760, %v3926_v17 }
 0x699   :  { %8164 = vmatprep.subr.bf16.mxu0 %v8613_v13  ;;  %v4032_v0 = vand.u32 4294901760, %v9434_v40 }
 0x69a   :  { %v9432_v39 = vsub.f32 %v3926_v17, %v3939_v10  ;;  %v4069_v17 = vand.u32 4294901760, %v4068_v46 }
 0x69b   :  { %v4033_v15 = vsub.f32 %v9434_v40, %v4032_v0 }
 0x69c   :  { %8166 = vmatpush3.bf16.msra.mxu0 %v9327_v41  ;;  %v9430_v41 = vpack.c.bf16 %v3942_v32, %v3939_v10  ;;  %v4025_v8 = vand.u32 4294901760, %v9432_v39  ;;  %v8189_v10 = vpack.c.bf16 %v4076_v38, %v4069_v17  ;;  %v8192_v32 = vpack.c.bf16 %v9434_v40, %v9432_v39 }
 0x69d   :  { %7352 = vmatprep.subr.mxu0 %v8614_v23  ;;  %v4034_v6 = vand.u32 4294901760, %v4033_v15  ;;  %v4496_v15 = vld [vmem:[%s10011_s1 + $0x1c0] sm:$0xff] }
 0x69e   :  { %8169 = vmatpush3.bf16.msra.mxu1 %v9430_v41  ;;  %v4026_v45 = vsub.f32 %v9432_v39, %v4025_v8 }
 0x69f   :  { %8170 = vmatprep.subr.bf16.mxu1 %v8613_v13 }
 0x6a0   :  { %7353 = vmatpush3.msra.mxu0 %v9336_v50  ;;  %v3929_v50 = vld [vmem:[%s10011_s1 + $0x170] sm:$0xff]  ;;  %v4027_v54 = vand.u32 4294901760, %v4026_v45  ;;  %v4495_v45 = vld [vmem:[%s10011_s1 + $0x1b8] sm:$0xff] }
 0x6a1   :  { %7355 = vmatmul.mubr.f32.vlgmr.msra.gmra.mrb[8].mxu0 %v9370_v18  ;;  %8239 = vmatprep.subr.bf16.mxu0 %v8613_v13  ;;  %v3948_v53 = vand.u32 4294901760, %v3929_v50  ;;  %v4054_v18 = vsub.f32 %v9462_v1, %v4053_v12 }
 0x6a2   :  { %7501 = vmatprep.mubr.msk.f32.mxu0 %vm8615_vm1, %v8614_v23  ;;  %v8180_v27 = vpack.c.bf16 %v4034_v6, %v4027_v54  ;;  %v4514_v6 = vand.u32 4294901760, %v4495_v45 }
 0x6a3   :  { %v9456_v60 = vpack.c.bf16 %v3948_v53, %v3945_v52  ;;  %v9460_v62 = vsub.f32 %v3929_v50, %v3948_v53  ;;  %v4055_v36 = vand.u32 4294901760, %v4054_v18  ;;  %v8198_v50 = vpack.c.bf16 %v9464_v56, %v9462_v1 }
 0x6a4   :  { %v8216_v52 = vpack.c.bf16 %v4032_v0, %v4025_v8 }
 0x6a5   :  { %8172 = vmatpush3.bf16.msra.mxu1 %v9456_v60  ;;  %v4046_v16 = vand.u32 4294901760, %v9460_v62  ;;  %v8186_v44 = vpack.c.bf16 %v4062_v37, %v4055_v36  ;;  %v8195_v43 = vpack.c.bf16 %v9460_v62, %v9458_v61 }
 0x6a6   :  { %8173 = vmatprep.subr.bf16.mxu1 %v8613_v13 }
 0x6a7   :  { %v4047_v29 = vsub.f32 %v9460_v62, %v4046_v16  ;;  %v8219_v53 = vpack.c.bf16 %v4046_v16, %v4039_v14  ;;  %v4497_v14 = vld [vmem:[%s10011_s1 + $0x1c8] sm:$0xff]  ;;  %v4517_v16 = vand.u32 4294901760, %v4496_v15 }
 0x6a9   :  { %8175 = vmatpush3.bf16.msra.mxu1 %v9469_v3  ;;  %v4048_v31 = vand.u32 4294901760, %v4047_v29  ;;  %v4520_v29 = vand.u32 4294901760, %v4497_v14  ;;  %v9607_v18 = vsub.f32 %v4496_v15, %v4517_v16 }
 0x6aa   :  { %8176 = vmatprep.subr.bf16.mxu1 %v8613_v13 }
 0x6ab   :  { %v8183_v26 = vpack.c.bf16 %v4048_v31, %v4041_v30  ;;  %v4526_v31 = vand.u32 4294901760, %v4499_v28  ;;  %v9609_v19 = vsub.f32 %v4497_v14, %v4520_v29  ;;  %v9614_v37 = vpack.c.bf16 %v4520_v29, %v4517_v16 }
 0x6ad   :  { %8178 = vmatpush3.bf16.msra.mxu1 %v9475_v5  ;;  %v9616_v42 = vsub.f32 %v4499_v28, %v4526_v31 }
 0x6ae   :  { %7373 = vmatprep.subr.mxu1 %v8614_v23 }
 0x6b1   :  { %7374 = vmatpush3.msra.mxu1 %v9484_v9 }
 0x6b2   :  { %8179 = vmatprep.subr.bf16.mxu1 %v8613_v13 }
 0x774   :  { %v3918_v22 = vpop.f32.mrb[8].mxu0 }
 0x775   :  { %v3922_v24 = vmax.f32 %v3918_v22, 0.0  ;;  %v7356_v57 = vpop.f32.mrb[9].mxu0 }
 0x776   :  { %v4626_v57 = vand.u32 4294901760, %v9609_v19 }
 0x777   :  { %v3923_v58 = vadd.f32 %v3922_v24, %v3356_v11  ;;  %v4082_v11 = vsub.f32 %v4080_v2, %v4081_v35  ;;  %v4619_v24 = vand.u32 4294901760, %v9607_v18 }
 0x779   :  { %3924 = vst.msk [vmem:[#allocation2] sm:$0xff] %vm3357_vm10, %v3923_v58  ;;  %v4083_v4 = vand.u32 4294901760, %v4082_v11 }
 0x780   :  { %v3925_v39 = vld [vmem:[#allocation2] sm:$0xff] }
 0x781   :  { %v3936_v40 = vsel %vm1640_vm4, %v3925_v39, 0  ;;  %v4620_v39 = vsub.f32 %v9607_v18, %v4619_v24 }
 0x782   :  { %v9515_v59 = vand.u32 4294901760, %v3936_v40 }
 0x784   :  { %v4013_v61 = vsub.f32 %v3936_v40, %v9515_v59  ;;  %v4627_v40 = vsub.f32 %v9609_v19, %v4626_v57 }
 0x786   :  { %v4014_v62 = vand.u32 4294901760, %v4013_v61 }
 0x788   :  { %v4015_v1 = vsub.f32 %v4013_v61, %v4014_v62 }
 0x78a   :  { %v4016_v56 = vand.u32 4294901760, %v4015_v1  ;;  %v4640_v1 = vand.u32 4294901760, %v9616_v42 }
 0x78c   :  { %7376 = vmatmul.mubr.f32.vlgmr.msra.gmra.mrb[14].mxu1 %v4016_v56 }
 0x78d   :  { %8181 = vmatpush3.bf16.msra.mxu1 %v8180_v27  ;;  %7396 = vmatprep.mubr.msk.f32.mxu1 %vm8615_vm1, %v8614_v23  ;;  %v4498_v27 = vld [vmem:[%s10011_s1 + $0x1d0] sm:$0xff] }
 0x78e   :  { %8182 = vmatprep.subr.bf16.mxu1 %v8613_v13  ;;  %v4523_v30 = vand.u32 4294901760, %v4498_v27 }
 0x790   :  { %v9611_v36 = vsub.f32 %v4498_v27, %v4523_v30  ;;  %v9620_v33 = vpack.c.bf16 %v4526_v31, %v4523_v30 }
 0x791   :  { %8184 = vmatpush3.bf16.msra.mxu1 %v8183_v26  ;;  %v9605_v26 = vsub.f32 %v4495_v45, %v4514_v6 }
 0x792   :  { %8185 = vmatprep.subr.bf16.mxu1 %v8613_v13 }
 0x795   :  { %8187 = vmatpush3.bf16.msra.mxu1 %v8186_v44  ;;  %v4500_v44 = vld [vmem:[%s10011_s1 + $0x1e0] sm:$0xff] }
 0x796   :  { %8188 = vmatprep.subr.bf16.mxu1 %v8613_v13  ;;  %v9629_v17 = vand.u32 4294901760, %v4500_v44 }
 0x799   :  { %8190 = vmatpush3.bf16.msra.mxu1 %v8189_v10 }
 0x79a   :  { %7394 = vmatprep.subr.mxu1 %v8614_v23 }
 0x79d   :  { %7395 = vmatpush3.msra.mxu1 %v4083_v4 }
 0x79e   :  { %7397 = vmatmul.mubr.f32.vlgmr.msra.gmra.mrb[14].mxu1 %v9515_v59  ;;  %8191 = vmatprep.subr.bf16.mxu1 %v8613_v13 }
 0x79f   :  { %8193 = vmatpush3.bf16.msra.mxu1 %v8192_v32  ;;  %7417 = vmatprep.mubr.msk.f32.mxu1 %vm8615_vm1, %v8614_v23 }
 0x7a0   :  { %8194 = vmatprep.subr.bf16.mxu1 %v8613_v13 }
 0x7a3   :  { %8196 = vmatpush3.bf16.msra.mxu1 %v8195_v43 }
 0x7a4   :  { %8197 = vmatprep.subr.bf16.mxu1 %v8613_v13 }
 0x7a7   :  { %8199 = vmatpush3.bf16.msra.mxu1 %v8198_v50 }
 0x7a8   :  { %8200 = vmatprep.subr.bf16.mxu1 %v8613_v13 }
 0x7ab   :  { %8202 = vmatpush3.bf16.msra.mxu1 %v8201_v51  ;;  %v4612_v51 = vand.u32 4294901760, %v9605_v26 }
 0x7ac   :  { %7415 = vmatprep.subr.mxu1 %v8614_v23 }
 0x7af   :  { %7416 = vmatpush3.msra.mxu1 %v4080_v2 }
 0x7b0   :  { %7418 = vmatmul.mubr.f32.vlgmr.msra.gmra.mrb[14].mxu1 %v4013_v61  ;;  %8203 = vmatprep.subr.bf16.mxu1 %v8613_v13  ;;  %v4628_v61 = vand.u32 4294901760, %v4627_v40 }
 0x7b1   :  { %8205 = vmatpush3.bf16.msra.mxu1 %v9430_v41  ;;  %7438 = vmatprep.mubr.msk.f32.mxu1 %vm8615_vm1, %v8614_v23 }
 0x7b2   :  { %8206 = vmatprep.subr.bf16.mxu1 %v8613_v13 }
 0x7b5   :  { %8208 = vmatpush3.bf16.msra.mxu1 %v9456_v60 }
 0x7b6   :  { %8209 = vmatprep.subr.bf16.mxu1 %v8613_v13 }
 0x7b9   :  { %8211 = vmatpush3.bf16.msra.mxu1 %v9469_v3 }
 0x7ba   :  { %8212 = vmatprep.subr.bf16.mxu1 %v8613_v13 }
 0x7bd   :  { %8214 = vmatpush3.bf16.msra.mxu1 %v9475_v5 }
 0x7be   :  { %7436 = vmatprep.subr.mxu1 %v8614_v23 }
 0x7c1   :  { %7437 = vmatpush3.msra.mxu1 %v9484_v9 }
 0x7c2   :  { %7439 = vmatmul.mubr.f32.vlgmr.msra.gmra.mrb[14].mxu1 %v4014_v62  ;;  %8215 = vmatprep.subr.bf16.mxu1 %v8613_v13  ;;  %v4633_v62 = vand.u32 4294901760, %v9611_v36 }
 0x7c3   :  { %8217 = vmatpush3.bf16.msra.mxu1 %v8216_v52  ;;  %7459 = vmatprep.mubr.msk.f32.mxu1 %vm8615_vm1, %v8614_v23 }
 0x7c4   :  { %8218 = vmatprep.subr.bf16.mxu1 %v8613_v13  ;;  %v4634_v2 = vsub.f32 %v9611_v36, %v4633_v62 }
 0x7c6   :  { %v4635_v11 = vand.u32 4294901760, %v4634_v2 }
 0x7c7   :  { %8220 = vmatpush3.bf16.msra.mxu1 %v8219_v53 }
 0x7c8   :  { %8221 = vmatprep.subr.bf16.mxu1 %v8613_v13 }
 0x7cb   :  { %8223 = vmatpush3.bf16.msra.mxu1 %v8222_v20  ;;  %v4613_v20 = vsub.f32 %v9605_v26, %v4612_v51 }
 0x7cc   :  { %8224 = vmatprep.subr.bf16.mxu1 %v8613_v13 }
 0x7cd   :  { %v4614_v22 = vand.u32 4294901760, %v4613_v20 }
 0x7cf   :  { %8226 = vmatpush3.bf16.msra.mxu1 %v8225_v21 }
 0x7d0   :  { %7457 = vmatprep.subr.mxu1 %v8614_v23 }
 0x7d3   :  { %7458 = vmatpush3.msra.mxu1 %v4081_v35  ;;  %v4641_v35 = vsub.f32 %v9616_v42, %v4640_v1 }
 0x7d4   :  { %7460 = vmatmul.mubr.f32.vlgmr.msra.gmra.mrb[14].mxu1 %v9515_v59  ;;  %8227 = vmatprep.subr.bf16.mxu1 %v8613_v13 }
 0x7d5   :  { %8229 = vmatpush3.bf16.msra.mxu1 %v9430_v41  ;;  %7480 = vmatprep.mubr.msk.f32.mxu1 %vm8615_vm1, %v8614_v23  ;;  %v4492_v41 = vld [vmem:[%s10011_s1 + $0x1a0] sm:$0xff]  ;;  %v4642_v4 = vand.u32 4294901760, %v4641_v35 }
 0x7d6   :  { %8230 = vmatprep.subr.bf16.mxu1 %v8613_v13 }
 0x7d9   :  { %8232 = vmatpush3.bf16.msra.mxu1 %v9456_v60  ;;  %v4493_v60 = vld [vmem:[%s10011_s1 + $0x1a8] sm:$0xff] }
 0x7da   :  { %8233 = vmatprep.subr.bf16.mxu1 %v8613_v13 }
 0x7dd   :  { %8235 = vmatpush3.bf16.msra.mxu1 %v9469_v3  ;;  %v4505_v3 = vand.u32 4294901760, %v4492_v41 }
 0x7de   :  { %8236 = vmatprep.subr.bf16.mxu1 %v8613_v13 }
 0x7df   :  { %v9577_v8 = vsub.f32 %v4492_v41, %v4505_v3  ;;  %v8261_v41 = vpack.c.bf16 %v4642_v4, %v4635_v11 }
 0x7e1   :  { %8238 = vmatpush3.bf16.msra.mxu1 %v9475_v5  ;;  %v4508_v5 = vand.u32 4294901760, %v4493_v60  ;;  %v4591_v46 = vand.u32 4294901760, %v9577_v8 }
 0x7e2   :  { %7478 = vmatprep.subr.mxu1 %v8614_v23 }
 0x7e3   :  { %v9575_v7 = vpack.c.bf16 %v4508_v5, %v4505_v3  ;;  %v9579_v0 = vsub.f32 %v4493_v60, %v4508_v5  ;;  %v4592_v38 = vsub.f32 %v9577_v8, %v4591_v46  ;;  %v8270_v5 = vpack.c.bf16 %v9609_v19, %v9607_v18 }
 0x7e4   :  { %v4646_v18 = vsub.f32 %v4500_v44, %v9629_v17 }
 0x7e5   :  { %7479 = vmatpush3.msra.mxu1 %v9484_v9  ;;  %v4494_v9 = vld [vmem:[%s10011_s1 + $0x1b0] sm:$0xff]  ;;  %8241 = vmatpush3.bf16.msra.mxu0 %v9575_v7  ;;  %v4598_v47 = vand.u32 4294901760, %v9579_v0  ;;  %v4593_v32 = vand.u32 4294901760, %v4592_v38  ;;  %v8264_v60 = vpack.c.bf16 %v9579_v0, %v9577_v8 }
 0x7e6   :  { %7481 = vmatmul.mubr.f32.vlgmr.msra.gmra.mrb[14].mxu1 %v9515_v59  ;;  %8311 = vmatprep.subr.bf16.mxu1 %v8613_v13  ;;  %v4511_v54 = vand.u32 4294901760, %v4494_v9  ;;  %v4621_v59 = vand.u32 4294901760, %v4620_v39  ;;  %v4647_v63 = vand.u32 4294901760, %v4646_v18 }
 0x7e7   :  { %7627 = vmatprep.mubr.msk.f32.mxu1 %vm8615_vm1, %v8614_v23  ;;  %8242 = vmatprep.subr.bf16.mxu0 %v8613_v13  ;;  %v4599_v10 = vsub.f32 %v9579_v0, %v4598_v47  ;;  %v8288_v45 = vpack.c.bf16 %v4598_v47, %v4591_v46  ;;  %v5060_v46 = vld [vmem:[%s10011_s1 + $0x1f8] sm:$0xff]  ;;  %v5061_v47 = vld [vmem:[%s10011_s1 + $0x200] sm:$0xff] }
 0x7e8   :  { %v9601_v12 = vpack.c.bf16 %v4514_v6, %v4511_v54  ;;  %v9603_v25 = vsub.f32 %v4494_v9, %v4511_v54  ;;  %v8258_v56 = vpack.c.bf16 %v4628_v61, %v4621_v59  ;;  %v8273_v9 = vpack.c.bf16 %v9616_v42, %v9611_v36 }
 0x7e9   :  { %v4600_v43 = vand.u32 4294901760, %v4599_v10  ;;  %v8294_v54 = vpack.c.bf16 %v4626_v57, %v4619_v24  ;;  %v8297_v6 = vpack.c.bf16 %v4640_v1, %v4633_v62  ;;  %v5077_v38 = vand.u32 4294901760, %v5060_v46  ;;  %v5066_v62 = vld [vmem:[%s10011_s1 + $0x228] sm:$0xff] }
 0x7ea   :  { %8244 = vmatpush3.bf16.msra.mxu0 %v9601_v12  ;;  %v4605_v50 = vand.u32 4294901760, %v9603_v25  ;;  %v8267_v3 = vpack.c.bf16 %v9605_v26, %v9603_v25  ;;  %v5080_v10 = vand.u32 4294901760, %v5061_v47  ;;  %v9774_v2 = vand.u32 4294901760, %v5066_v62 }
 0x7eb   :  { %8245 = vmatprep.subr.bf16.mxu0 %v8613_v13  ;;  %v8252_v52 = vpack.c.bf16 %v4600_v43, %v4593_v32  ;;  %v5063_v32 = vld [vmem:[%s10011_s1 + $0x210] sm:$0xff] }
 0x7ec   :  { %v4606_v53 = vsub.f32 %v9603_v25, %v4605_v50  ;;  %v8291_v15 = vpack.c.bf16 %v4612_v51, %v4605_v50  ;;  %v5064_v50 = vld [vmem:[%s10011_s1 + $0x218] sm:$0xff]  ;;  %v5065_v51 = vld [vmem:[%s10011_s1 + $0x220] sm:$0xff]  ;;  %v9750_v24 = vsub.f32 %v5061_v47, %v5080_v10 }
 0x7ed   :  { %v5092_v20 = vand.u32 4294901760, %v5065_v51 }
 0x7ee   :  { %8247 = vmatpush3.bf16.msra.mxu0 %v9614_v37  ;;  %v4607_v21 = vand.u32 4294901760, %v4606_v53  ;;  %v5089_v53 = vand.u32 4294901760, %v5064_v50 }
 0x7ef   :  { %8248 = vmatprep.subr.bf16.mxu0 %v8613_v13  ;;  %v9761_v59 = vsub.f32 %v5065_v51, %v5092_v20 }
 0x7f0   :  { %v8255_v58 = vpack.c.bf16 %v4614_v22, %v4607_v21  ;;  %v9746_v21 = vpack.c.bf16 %v5080_v10, %v5077_v38  ;;  %v9748_v22 = vsub.f32 %v5060_v46, %v5077_v38  ;;  %v9756_v39 = vsub.f32 %v5064_v50, %v5089_v53 }
 0x7f1   :  { %v9765_v61 = vpack.c.bf16 %v5092_v20, %v5089_v53 }
 0x7f2   :  { %8250 = vmatpush3.bf16.msra.mxu0 %v9620_v33 }
 0x7f3   :  { %7499 = vmatprep.subr.mxu0 %v8614_v23 }
 0x7f6   :  { %7500 = vmatpush3.msra.mxu0 %v9629_v17 }
 0x7f7   :  { %8251 = vmatprep.subr.bf16.mxu0 %v8613_v13 }
 0x8b9   :  { %v4484_v14 = vpop.f32.mrb[14].mxu1 }
 0x8ba   :  { %v4488_v16 = vmax.f32 %v4484_v14, 0.0  ;;  %v7482_v27 = vpop.f32.mrb[15].mxu1 }
 0x8bc   :  { %v4489_v28 = vadd.f32 %v4488_v16, %v2791_v55  ;;  %v4648_v55 = vsub.f32 %v4646_v18, %v4647_v63 }
 0x8be   :  { %4490 = vst.msk [vmem:[#allocation2] sm:$0xff] %vm615_vm14, %v4489_v28  ;;  %v4649_v19 = vand.u32 4294901760, %v4648_v55 }
 0x8c5   :  { %v4491_v8 = vld [vmem:[#allocation2] sm:$0xff] }
 0x8c6   :  { %v4502_v0 = vsel %vm1640_vm4, %v4491_v8, 0 }
 0x8c7   :  { %v9660_v29 = vand.u32 4294901760, %v4502_v0 }
 0x8c9   :  { %v4579_v30 = vsub.f32 %v4502_v0, %v9660_v29 }
 0x8cb   :  { %v4580_v31 = vand.u32 4294901760, %v4579_v30 }
 0x8cd   :  { %v4581_v25 = vsub.f32 %v4579_v30, %v4580_v31 }
 0x8cf   :  { %v4582_v26 = vand.u32 4294901760, %v4581_v25 }
 0x8d1   :  { %7502 = vmatmul.mubr.f32.vlgmr.msra.gmra.mrb[10].mxu0 %v4582_v26 }
 0x8d2   :  { %8253 = vmatpush3.bf16.msra.mxu0 %v8252_v52  ;;  %7522 = vmatprep.mubr.msk.f32.mxu0 %vm8615_vm1, %v8614_v23  ;;  %v5086_v52 = vand.u32 4294901760, %v5063_v32 }
 0x8d3   :  { %8254 = vmatprep.subr.bf16.mxu0 %v8613_v13 }
 0x8d6   :  { %8256 = vmatpush3.bf16.msra.mxu0 %v8255_v58  ;;  %v9754_v58 = vsub.f32 %v5063_v32, %v5086_v52 }
 0x8d7   :  { %8257 = vmatprep.subr.bf16.mxu0 %v8613_v13 }
 0x8d8   :  { %v5192_v14 = vand.u32 4294901760, %v9754_v58 }
 0x8da   :  { %8259 = vmatpush3.bf16.msra.mxu0 %v8258_v56  ;;  %v5193_v28 = vsub.f32 %v9754_v58, %v5192_v14 }
 0x8db   :  { %8260 = vmatprep.subr.bf16.mxu0 %v8613_v13 }
 0x8dc   :  { %v5194_v0 = vand.u32 4294901760, %v5193_v28 }
 0x8de   :  { %8262 = vmatpush3.bf16.msra.mxu0 %v8261_v41 }
 0x8df   :  { %7520 = vmatprep.subr.mxu0 %v8614_v23 }
 0x8e2   :  { %7521 = vmatpush3.msra.mxu0 %v4649_v19 }
 0x8e3   :  { %7523 = vmatmul.mubr.f32.vlgmr.msra.gmra.mrb[10].mxu0 %v9660_v29  ;;  %8263 = vmatprep.subr.bf16.mxu0 %v8613_v13 }
 0x8e4   :  { %8265 = vmatpush3.bf16.msra.mxu0 %v8264_v60  ;;  %7543 = vmatprep.mubr.msk.f32.mxu0 %vm8615_vm1, %v8614_v23  ;;  %v5171_v60 = vand.u32 4294901760, %v9748_v22 }
 0x8e5   :  { %8266 = vmatprep.subr.bf16.mxu0 %v8613_v13 }
 0x8e8   :  { %8268 = vmatpush3.bf16.msra.mxu0 %v8267_v3  ;;  %v5178_v3 = vand.u32 4294901760, %v9750_v24 }
 0x8e9   :  { %8269 = vmatprep.subr.bf16.mxu0 %v8613_v13 }
 0x8ea   :  { %v8363_v46 = vpack.c.bf16 %v5178_v3, %v5171_v60 }
 0x8ec   :  { %8271 = vmatpush3.bf16.msra.mxu0 %v8270_v5 }
 0x8ed   :  { %8272 = vmatprep.subr.bf16.mxu0 %v8613_v13 }
 0x8f0   :  { %8274 = vmatpush3.bf16.msra.mxu0 %v8273_v9  ;;  %v5172_v9 = vsub.f32 %v9748_v22, %v5171_v60 }
 0x8f1   :  { %7541 = vmatprep.subr.mxu0 %v8614_v23 }
 0x8f4   :  { %7542 = vmatpush3.msra.mxu0 %v4646_v18 }
 0x8f5   :  { %7544 = vmatmul.mubr.f32.vlgmr.msra.gmra.mrb[10].mxu0 %v4579_v30  ;;  %8275 = vmatprep.subr.bf16.mxu0 %v8613_v13  ;;  %v5206_v30 = vand.u32 4294901760, %v9761_v59 }
 0x8f6   :  { %8277 = vmatpush3.bf16.msra.mxu0 %v9575_v7  ;;  %7564 = vmatprep.mubr.msk.f32.mxu0 %vm8615_vm1, %v8614_v23 }
 0x8f7   :  { %8278 = vmatprep.subr.bf16.mxu0 %v8613_v13  ;;  %v5207_v26 = vsub.f32 %v9761_v59, %v5206_v30 }
 0x8fa   :  { %8280 = vmatpush3.bf16.msra.mxu0 %v9601_v12 }
 0x8fb   :  { %8281 = vmatprep.subr.bf16.mxu0 %v8613_v13 }
 0x8fe   :  { %8283 = vmatpush3.bf16.msra.mxu0 %v9614_v37 }
 0x8ff   :  { %8284 = vmatprep.subr.bf16.mxu0 %v8613_v13 }
 0x902   :  { %8286 = vmatpush3.bf16.msra.mxu0 %v9620_v33 }
 0x903   :  { %7562 = vmatprep.subr.mxu0 %v8614_v23 }
 0x906   :  { %7563 = vmatpush3.msra.mxu0 %v9629_v17 }
 0x907   :  { %7565 = vmatmul.mubr.f32.vlgmr.msra.gmra.mrb[10].mxu0 %v4580_v31  ;;  %8287 = vmatprep.subr.bf16.mxu0 %v8613_v13 }
 0x908   :  { %8289 = vmatpush3.bf16.msra.mxu0 %v8288_v45  ;;  %7585 = vmatprep.mubr.msk.f32.mxu0 %vm8615_vm1, %v8614_v23  ;;  %v5179_v45 = vsub.f32 %v9750_v24, %v5178_v3 }
 0x909   :  { %8290 = vmatprep.subr.bf16.mxu0 %v8613_v13 }
 0x90c   :  { %8292 = vmatpush3.bf16.msra.mxu0 %v8291_v15  ;;  %v5173_v15 = vand.u32 4294901760, %v5172_v9 }
 0x90d   :  { %8293 = vmatprep.subr.bf16.mxu0 %v8613_v13 }
 0x910   :  { %8295 = vmatpush3.bf16.msra.mxu0 %v8294_v54  ;;  %v5180_v54 = vand.u32 4294901760, %v5179_v45 }
 0x911   :  { %8296 = vmatprep.subr.bf16.mxu0 %v8613_v13 }
 0x912   :  { %v8327_v16 = vpack.c.bf16 %v5180_v54, %v5173_v15 }
 0x914   :  { %8298 = vmatpush3.bf16.msra.mxu0 %v8297_v6 }
 0x915   :  { %7583 = vmatprep.subr.mxu0 %v8614_v23 }
 0x918   :  { %7584 = vmatpush3.msra.mxu0 %v4647_v63  ;;  %v5208_v63 = vand.u32 4294901760, %v5207_v26 }
 0x919   :  { %7586 = vmatmul.mubr.f32.vlgmr.msra.gmra.mrb[10].mxu0 %v9660_v29  ;;  %8299 = vmatprep.subr.bf16.mxu0 %v8613_v13 }
 0x91a   :  { %8301 = vmatpush3.bf16.msra.mxu0 %v9575_v7  ;;  %7606 = vmatprep.mubr.msk.f32.mxu0 %vm8615_vm1, %v8614_v23  ;;  %v5058_v7 = vld [vmem:[%s10011_s1 + $0x1e8] sm:$0xff] }
 0x91b   :  { %8302 = vmatprep.subr.bf16.mxu0 %v8613_v13  ;;  %v5071_v36 = vand.u32 4294901760, %v5058_v7 }
 0x91e   :  { %8304 = vmatpush3.bf16.msra.mxu0 %v9601_v12  ;;  %v5059_v12 = vld [vmem:[%s10011_s1 + $0x1f0] sm:$0xff] }
 0x91f   :  { %8305 = vmatprep.subr.bf16.mxu0 %v8613_v13 }
 0x922   :  { %8307 = vmatpush3.bf16.msra.mxu0 %v9614_v37  ;;  %v5074_v37 = vand.u32 4294901760, %v5059_v12 }
 0x923   :  { %8308 = vmatprep.subr.bf16.mxu0 %v8613_v13 }
 0x924   :  { %v9720_v42 = vpack.c.bf16 %v5074_v37, %v5071_v36  ;;  %v9724_v44 = vsub.f32 %v5059_v12, %v5074_v37 }
 0x926   :  { %8310 = vmatpush3.bf16.msra.mxu0 %v9620_v33  ;;  %v9722_v33 = vsub.f32 %v5058_v7, %v5071_v36  ;;  %8313 = vmatpush3.bf16.msra.mxu1 %v9720_v42  ;;  %v5164_v56 = vand.u32 4294901760, %v9724_v44  ;;  %v8339_v7 = vpack.c.bf16 %v9750_v24, %v9748_v22  ;;  %v8345_v36 = vpack.c.bf16 %v9761_v59, %v9756_v39 }
 0x927   :  { %7604 = vmatprep.subr.mxu0 %v8614_v23  ;;  %8314 = vmatprep.subr.bf16.mxu1 %v8613_v13  ;;  %v5212_v22 = vsub.f32 %v5066_v62, %v9774_v2  ;;  %v5627_v62 = vld [vmem:[%s10011_s1 + $0x248] sm:$0xff] }
 0x928   :  { %v5157_v1 = vand.u32 4294901760, %v9722_v33  ;;  %v5165_v11 = vsub.f32 %v9724_v44, %v5164_v56  ;;  %v8336_v19 = vpack.c.bf16 %v9724_v44, %v9722_v33 }
 0x929   :  { %v5213_v48 = vand.u32 4294901760, %v5212_v22 }
 0x92a   :  { %7605 = vmatpush3.msra.mxu0 %v9629_v17  ;;  %v5062_v17 = vld [vmem:[%s10011_s1 + $0x208] sm:$0xff]  ;;  %8316 = vmatpush3.bf16.msra.mxu1 %v9746_v21  ;;  %v5158_v35 = vsub.f32 %v9722_v33, %v5157_v1  ;;  %v5166_v41 = vand.u32 4294901760, %v5165_v11  ;;  %v8360_v37 = vpack.c.bf16 %v5164_v56, %v5157_v1  ;;  %v5628_v1 = vld [vmem:[%s10011_s1 + $0x250] sm:$0xff] }
 0x92b   :  { %7607 = vmatmul.mubr.f32.vlgmr.msra.gmra.mrb[10].mxu0 %v9660_v29  ;;  %8383 = vmatprep.subr.bf16.mxu0 %v8613_v13  ;;  %v5083_v43 = vand.u32 4294901760, %v5062_v17  ;;  %v5199_v29 = vand.u32 4294901760, %v9756_v39  ;;  %v5649_v11 = vand.u32 4294901760, %v5628_v1 }
 0x92c   :  { %7753 = vmatprep.mubr.msk.f32.mxu0 %vm8615_vm1, %v8614_v23  ;;  %8317 = vmatprep.subr.bf16.mxu1 %v8613_v13  ;;  %v5159_v4 = vand.u32 4294901760, %v5158_v35  ;;  %v5629_v35 = vld [vmem:[%s10011_s1 + $0x258] sm:$0xff] }
 0x92d   :  { %v9752_v57 = vsub.f32 %v5062_v17, %v5083_v43  ;;  %v9759_v40 = vpack.c.bf16 %v5086_v52, %v5083_v43  ;;  %v5200_v25 = vsub.f32 %v9756_v39, %v5199_v29  ;;  %v8369_v17 = vpack.c.bf16 %v5206_v30, %v5199_v29 }
 0x92e   :  { %v8324_v5 = vpack.c.bf16 %v5166_v41, %v5159_v4  ;;  %v5630_v4 = vld [vmem:[%s10011_s1 + $0x260] sm:$0xff]  ;;  %v5631_v41 = vld [vmem:[%s10011_s1 + $0x268] sm:$0xff]  ;;  %v5652_v60 = vand.u32 4294901760, %v5629_v35  ;;  %v9894_v54 = vsub.f32 %v5628_v1, %v5649_v11 }
 0x92f   :  { %8319 = vmatpush3.bf16.msra.mxu1 %v9759_v40  ;;  %v5185_v6 = vand.u32 4294901760, %v9752_v57  ;;  %v5201_v18 = vand.u32 4294901760, %v5200_v25  ;;  %v8342_v12 = vpack.c.bf16 %v9754_v58, %v9752_v57  ;;  %v5655_v3 = vand.u32 4294901760, %v5630_v4 }
 0x930   :  { %8320 = vmatprep.subr.bf16.mxu1 %v8613_v13 }
 0x931   :  { %v5186_v27 = vsub.f32 %v9752_v57, %v5185_v6  ;;  %v8333_v55 = vpack.c.bf16 %v5208_v63, %v5201_v18  ;;  %v8366_v47 = vpack.c.bf16 %v5192_v14, %v5185_v6  ;;  %v9896_v6 = vsub.f32 %v5629_v35, %v5652_v60 }
 0x932   :  { %v9898_v14 = vsub.f32 %v5630_v4, %v5655_v3 }
 0x933   :  { %8322 = vmatpush3.bf16.msra.mxu1 %v9765_v61  ;;  %v5187_v8 = vand.u32 4294901760, %v5186_v27 }
 0x934   :  { %7625 = vmatprep.subr.mxu1 %v8614_v23 }
 0x935   :  { %v8330_v31 = vpack.c.bf16 %v5194_v0, %v5187_v8  ;;  %v5632_v8 = vld [vmem:[%s10011_s1 + $0x270] sm:$0xff] }
 0x936   :  { %v9916_v30 = vand.u32 4294901760, %v5632_v8 }
 0x937   :  { %7626 = vmatpush3.msra.mxu1 %v9774_v2 }
 0x938   :  { %8323 = vmatprep.subr.bf16.mxu1 %v8613_v13 }
 0x9fe   :  { %v5050_v38 = vpop.f32.mrb[10].mxu0 }
 0x9ff   :  { %v5054_v10 = vmax.f32 %v5050_v38, 0.0  ;;  %v7608_v32 = vpop.f32.mrb[11].mxu0 }
 0xa01   :  { %v5055_v43 = vadd.f32 %v5054_v10, %v2225_v49  ;;  %v5214_v49 = vsub.f32 %v5212_v22, %v5213_v48 }
 0xa03   :  { %5056 = vst.msk [vmem:[#allocation2] sm:$0xff] %vm2226_vm9, %v5055_v43  ;;  %v5215_v24 = vand.u32 4294901760, %v5214_v49 }
 0xa0a   :  { %v5057_v33 = vld [vmem:[#allocation2] sm:$0xff] }
 0xa0b   :  { %v5068_v44 = vsel %vm1640_vm4, %v5057_v33, 0  ;;  %v5765_v33 = vand.u32 4294901760, %v9898_v14 }
 0xa0c   :  { %v9805_v50 = vand.u32 4294901760, %v5068_v44 }
 0xa0e   :  { %v5145_v51 = vsub.f32 %v5068_v44, %v9805_v50 }
 0xa10   :  { %v5146_v52 = vand.u32 4294901760, %v5145_v51 }
 0xa12   :  { %v5147_v53 = vsub.f32 %v5145_v51, %v5146_v52 }
 0xa14   :  { %v5148_v20 = vand.u32 4294901760, %v5147_v53 }
 0xa16   :  { %7628 = vmatmul.mubr.f32.vlgmr.msra.gmra.mrb[16].mxu1 %v5148_v20 }
 0xa17   :  { %8325 = vmatpush3.bf16.msra.mxu1 %v8324_v5  ;;  %7648 = vmatprep.mubr.msk.f32.mxu1 %vm8615_vm1, %v8614_v23  ;;  %v5658_v5 = vand.u32 4294901760, %v5631_v41 }
 0xa18   :  { %8326 = vmatprep.subr.bf16.mxu1 %v8613_v13 }
 0xa19   :  { %v9903_v27 = vsub.f32 %v5631_v41, %v5658_v5  ;;  %v9907_v28 = vpack.c.bf16 %v5658_v5, %v5655_v3  ;;  %v5778_v3 = vsub.f32 %v5632_v8, %v9916_v30 }
 0xa1b   :  { %8328 = vmatpush3.bf16.msra.mxu1 %v8327_v16  ;;  %v9901_v16 = vpack.c.bf16 %v5652_v60, %v5649_v11  ;;  %v5772_v44 = vand.u32 4294901760, %v9903_v27 }
 0xa1c   :  { %8329 = vmatprep.subr.bf16.mxu1 %v8613_v13 }
 0xa1f   :  { %8331 = vmatpush3.bf16.msra.mxu1 %v8330_v31 }
 0xa20   :  { %8332 = vmatprep.subr.bf16.mxu1 %v8613_v13 }
 0xa23   :  { %8334 = vmatpush3.bf16.msra.mxu1 %v8333_v55 }
 0xa24   :  { %7646 = vmatprep.subr.mxu1 %v8614_v23 }
 0xa27   :  { %7647 = vmatpush3.msra.mxu1 %v5215_v24  ;;  %v8414_v24 = vpack.c.bf16 %v9896_v6, %v9894_v54 }
 0xa28   :  { %7649 = vmatmul.mubr.f32.vlgmr.msra.gmra.mrb[16].mxu1 %v9805_v50  ;;  %8335 = vmatprep.subr.bf16.mxu1 %v8613_v13 }
 0xa29   :  { %8337 = vmatpush3.bf16.msra.mxu1 %v8336_v19  ;;  %7669 = vmatprep.mubr.msk.f32.mxu1 %vm8615_vm1, %v8614_v23 }
 0xa2a   :  { %8338 = vmatprep.subr.bf16.mxu1 %v8613_v13 }
 0xa2d   :  { %8340 = vmatpush3.bf16.msra.mxu1 %v8339_v7 }
 0xa2e   :  { %8341 = vmatprep.subr.bf16.mxu1 %v8613_v13 }
 0xa31   :  { %8343 = vmatpush3.bf16.msra.mxu1 %v8342_v12 }
 0xa32   :  { %8344 = vmatprep.subr.bf16.mxu1 %v8613_v13 }
 0xa35   :  { %8346 = vmatpush3.bf16.msra.mxu1 %v8345_v36 }
 0xa36   :  { %7667 = vmatprep.subr.mxu1 %v8614_v23 }
 0xa39   :  { %7668 = vmatpush3.msra.mxu1 %v5212_v22 }
 0xa3a   :  { %7670 = vmatmul.mubr.f32.vlgmr.msra.gmra.mrb[16].mxu1 %v5145_v51  ;;  %8347 = vmatprep.subr.bf16.mxu1 %v8613_v13  ;;  %v5766_v51 = vsub.f32 %v9898_v14, %v5765_v33 }
 0xa3b   :  { %8349 = vmatpush3.bf16.msra.mxu1 %v9720_v42  ;;  %7690 = vmatprep.mubr.msk.f32.mxu1 %vm8615_vm1, %v8614_v23 }
 0xa3c   :  { %8350 = vmatprep.subr.bf16.mxu1 %v8613_v13  ;;  %v5767_v53 = vand.u32 4294901760, %v5766_v51 }
 0xa3f   :  { %8352 = vmatpush3.bf16.msra.mxu1 %v9746_v21 }
 0xa40   :  { %8353 = vmatprep.subr.bf16.mxu1 %v8613_v13 }
 0xa43   :  { %8355 = vmatpush3.bf16.msra.mxu1 %v9759_v40 }
 0xa44   :  { %8356 = vmatprep.subr.bf16.mxu1 %v8613_v13 }
 0xa47   :  { %8358 = vmatpush3.bf16.msra.mxu1 %v9765_v61 }
 0xa48   :  { %7688 = vmatprep.subr.mxu1 %v8614_v23 }
 0xa4b   :  { %7689 = vmatpush3.msra.mxu1 %v9774_v2 }
 0xa4c   :  { %7691 = vmatmul.mubr.f32.vlgmr.msra.gmra.mrb[16].mxu1 %v5146_v52  ;;  %8359 = vmatprep.subr.bf16.mxu1 %v8613_v13  ;;  %v5773_v52 = vsub.f32 %v9903_v27, %v5772_v44 }
 0xa4d   :  { %8361 = vmatpush3.bf16.msra.mxu1 %v8360_v37  ;;  %7711 = vmatprep.mubr.msk.f32.mxu1 %vm8615_vm1, %v8614_v23 }
 0xa4e   :  { %8362 = vmatprep.subr.bf16.mxu1 %v8613_v13  ;;  %v5774_v20 = vand.u32 4294901760, %v5773_v52 }
 0xa50   :  { %v8405_v22 = vpack.c.bf16 %v5774_v20, %v5767_v53 }
 0xa51   :  { %8364 = vmatpush3.bf16.msra.mxu1 %v8363_v46  ;;  %v5751_v46 = vand.u32 4294901760, %v9894_v54 }
 0xa52   :  { %8365 = vmatprep.subr.bf16.mxu1 %v8613_v13 }
 0xa53   :  { %v5752_v38 = vsub.f32 %v9894_v54, %v5751_v46 }
 0xa55   :  { %8367 = vmatpush3.bf16.msra.mxu1 %v8366_v47  ;;  %v5758_v47 = vand.u32 4294901760, %v9896_v6  ;;  %v5753_v32 = vand.u32 4294901760, %v5752_v38 }
 0xa56   :  { %8368 = vmatprep.subr.bf16.mxu1 %v8613_v13 }
 0xa57   :  { %v5759_v10 = vsub.f32 %v9896_v6, %v5758_v47 }
 0xa59   :  { %8370 = vmatpush3.bf16.msra.mxu1 %v8369_v17  ;;  %v5760_v43 = vand.u32 4294901760, %v5759_v10 }
 0xa5a   :  { %7709 = vmatprep.subr.mxu1 %v8614_v23 }
 0xa5d   :  { %7710 = vmatpush3.msra.mxu1 %v5213_v48 }
 0xa5e   :  { %7712 = vmatmul.mubr.f32.vlgmr.msra.gmra.mrb[16].mxu1 %v9805_v50  ;;  %8371 = vmatprep.subr.bf16.mxu1 %v8613_v13 }
 0xa5f   :  { %8373 = vmatpush3.bf16.msra.mxu1 %v9720_v42  ;;  %7732 = vmatprep.mubr.msk.f32.mxu1 %vm8615_vm1, %v8614_v23  ;;  %v5624_v42 = vld [vmem:[%s10011_s1 + $0x230] sm:$0xff] }
 0xa60   :  { %8374 = vmatprep.subr.bf16.mxu1 %v8613_v13  ;;  %v5637_v57 = vand.u32 4294901760, %v5624_v42 }
 0xa63   :  { %8376 = vmatpush3.bf16.msra.mxu1 %v9746_v21  ;;  %v5625_v21 = vld [vmem:[%s10011_s1 + $0x238] sm:$0xff] }
 0xa64   :  { %8377 = vmatprep.subr.bf16.mxu1 %v8613_v13  ;;  %v5640_v58 = vand.u32 4294901760, %v5625_v21 }
 0xa66   :  { %v9862_v39 = vpack.c.bf16 %v5640_v58, %v5637_v57  ;;  %v9866_v59 = vsub.f32 %v5625_v21, %v5640_v58  ;;  %v8438_v58 = vpack.c.bf16 %v5758_v47, %v5751_v46 }
 0xa67   :  { %8379 = vmatpush3.bf16.msra.mxu1 %v9759_v40  ;;  %v9864_v40 = vsub.f32 %v5624_v42, %v5637_v57  ;;  %v8417_v42 = vpack.c.bf16 %v9903_v27, %v9898_v14 }
 0xa68   :  { %8380 = vmatprep.subr.bf16.mxu1 %v8613_v13  ;;  %8385 = vmatpush3.bf16.msra.mxu0 %v9862_v39  ;;  %v5730_v29 = vand.u32 4294901760, %v9866_v59 }
 0xa69   :  { %8386 = vmatprep.subr.bf16.mxu0 %v8613_v13  ;;  %v5723_v0 = vand.u32 4294901760, %v9864_v40  ;;  %v8408_v48 = vpack.c.bf16 %v9866_v59, %v9864_v40 }
 0xa6a   :  { %v5731_v25 = vsub.f32 %v9866_v59, %v5730_v29 }
 0xa6b   :  { %8382 = vmatpush3.bf16.msra.mxu1 %v9765_v61  ;;  %v5626_v61 = vld [vmem:[%s10011_s1 + $0x240] sm:$0xff]  ;;  %v5724_v31 = vsub.f32 %v9864_v40, %v5723_v0  ;;  %v8432_v21 = vpack.c.bf16 %v5730_v29, %v5723_v0  ;;  %s8629_s1 = smov [#allocation3]  }
 0xa6c   :  { %7730 = vmatprep.subr.mxu1 %v8614_v23  ;;  %v5643_v56 = vand.u32 4294901760, %v5626_v61  ;;  %v5732_v18 = vand.u32 4294901760, %v5731_v25  ;;  %s6193_s27 = sshll.u32 %s8629_s1, 4  ;;  %s6194_s27 = int_to_ptr.vmem [resolvable:$true] %s6193_s27 }
 0xa6d   :  { %v5725_v26 = vand.u32 4294901760, %v5724_v31  ;;  %s8588_s28 = scalar_lea.vmem %s6194_s27, 128  ;;  %p8593_p1 = scmp.lt.s32.totalorder %s6194_s27, %s6194_s27 }
 0xa6e   :  { %v9890_v45 = vsub.f32 %v5626_v61, %v5643_v56  ;;  %v8441_v61 = vpack.c.bf16 %v5772_v44, %v5765_v33  ;;  %p8589_p0 = scmp.ne.s32.totalorder %s6194_s27, %s8588_s28  ;;  %p8594_p2 = scmp.lt.s32.totalorder %s8588_s28, %s8588_s28 }
 0xa6f   :  { %7731 = vmatpush3.msra.mxu1 %v9774_v2  ;;  %v5646_v2 = vand.u32 4294901760, %v5627_v62  ;;  %v8396_v19 = vpack.c.bf16 %v5732_v18, %v5725_v26 }
 0xa70   :  { %7733 = vmatmul.mubr.f32.vlgmr.msra.gmra.mrb[16].mxu1 %v9805_v50  ;;  %v5737_v63 = vand.u32 4294901760, %v9890_v45  ;;  %v8402_v50 = vpack.c.bf16 %v5760_v43, %v5753_v32  ;;  %p8595_p3 = por %p8594_p2, %p8593_p1 }
 0xa71   :  { %v9888_v9 = vpack.c.bf16 %v5646_v2, %v5643_v56  ;;  %v9892_v15 = vsub.f32 %v5627_v62, %v5646_v2 }
 0xa72   :  { %v5738_v7 = vsub.f32 %v9890_v45, %v5737_v63  ;;  %p8596_p4 = pnand %p8595_p3, %p8589_p0 }
 0xa73   :  { %8388 = vmatpush3.bf16.msra.mxu0 %v9888_v9  ;;  %v5744_v55 = vand.u32 4294901760, %v9892_v15  ;;  %v8411_v49 = vpack.c.bf16 %v9892_v15, %v9890_v45 }
 0xa74   :  { %8389 = vmatprep.subr.bf16.mxu0 %v8613_v13  ;;  %v5739_v36 = vand.u32 4294901760, %v5738_v7 }
 0xa75   :  { %v5745_v12 = vsub.f32 %v9892_v15, %v5744_v55  ;;  %v8435_v57 = vpack.c.bf16 %v5744_v55, %v5737_v63 }
 0xa77   :  { %8391 = vmatpush3.bf16.msra.mxu0 %v9901_v16  ;;  %v5746_v37 = vand.u32 4294901760, %v5745_v12 }
 0xa78   :  { %8392 = vmatprep.subr.bf16.mxu0 %v8613_v13 }
 0xa79   :  { %v8399_v17 = vpack.c.bf16 %v5746_v37, %v5739_v36 }
 0xa7b   :  { %8394 = vmatpush3.bf16.msra.mxu0 %v9907_v28 }
 0xa7c   :  { %7751 = vmatprep.subr.mxu0 %v8614_v23 }
 0xa7f   :  { %7752 = vmatpush3.msra.mxu0 %v9916_v30 }
 0xa80   :  { %8395 = vmatprep.subr.bf16.mxu0 %v8613_v13 }
 0xb43   :  { %v5616_v62 = vpop.f32.mrb[16].mxu1 }
 0xb44   :  { %v5620_v1 = vmax.f32 %v5616_v62, 0.0  ;;  %v7734_v56 = vpop.f32.mrb[17].mxu1 }
 0xb46   :  { %v5621_v2 = vadd.f32 %v5620_v1, %v8920_v34  ;;  %v5779_v34 = vand.u32 4294901760, %v5778_v3 }
 0xb48   :  { %5622 = vst.msk [vmem:[#allocation2] sm:$0xff] %vm1660_vm8, %v5621_v2  ;;  %v5780_v5 = vsub.f32 %v5778_v3, %v5779_v34 }
 0xb4a   :  { %v5781_v45 = vand.u32 4294901760, %v5780_v5 }
 0xb4f   :  { %v5623_v40 = vld [vmem:[#allocation2] sm:$0xff] }
 0xb50   :  { %v5634_v59 = vsel %vm1640_vm4, %v5623_v40, 0 }
 0xb51   :  { %v9946_v35 = vand.u32 4294901760, %v5634_v59 }
 0xb53   :  { %v5711_v11 = vsub.f32 %v5634_v59, %v9946_v35 }
 0xb55   :  { %v5712_v4 = vand.u32 4294901760, %v5711_v11 }
 0xb57   :  { %v5713_v41 = vsub.f32 %v5711_v11, %v5712_v4 }
 0xb59   :  { %v5714_v60 = vand.u32 4294901760, %v5713_v41 }
 0xb5b   :  { %7754 = vmatmul.mubr.f32.vlgmr.msra.gmra.mrb[12].mxu0 %v5714_v60 }
 0xb5c   :  { %8397 = vmatpush3.bf16.msra.mxu0 %v8396_v19  ;;  %7774 = vmatprep.mubr.msk.f32.mxu0 %vm8615_vm1, %v8614_v23 }
 0xb5d   :  { %8398 = vmatprep.subr.bf16.mxu0 %v8613_v13 }
 0xb60   :  { %8400 = vmatpush3.bf16.msra.mxu0 %v8399_v17 }
 0xb61   :  { %8401 = vmatprep.subr.bf16.mxu0 %v8613_v13 }
 0xb64   :  { %8403 = vmatpush3.bf16.msra.mxu0 %v8402_v50 }
 0xb65   :  { %8404 = vmatprep.subr.bf16.mxu0 %v8613_v13 }
 0xb68   :  { %8406 = vmatpush3.bf16.msra.mxu0 %v8405_v22 }
 0xb69   :  { %7772 = vmatprep.subr.mxu0 %v8614_v23 }
 0xb6c   :  { %7773 = vmatpush3.msra.mxu0 %v5781_v45 }
 0xb6d   :  { %7775 = vmatmul.mubr.f32.vlgmr.msra.gmra.mrb[12].mxu0 %v9946_v35  ;;  %8407 = vmatprep.subr.bf16.mxu0 %v8613_v13 }
 0xb6e   :  { %8409 = vmatpush3.bf16.msra.mxu0 %v8408_v48  ;;  %7795 = vmatprep.mubr.msk.f32.mxu0 %vm8615_vm1, %v8614_v23 }
 0xb6f   :  { %8410 = vmatprep.subr.bf16.mxu0 %v8613_v13 }
 0xb72   :  { %8412 = vmatpush3.bf16.msra.mxu0 %v8411_v49 }
 0xb73   :  { %8413 = vmatprep.subr.bf16.mxu0 %v8613_v13 }
 0xb76   :  { %8415 = vmatpush3.bf16.msra.mxu0 %v8414_v24 }
 0xb77   :  { %8416 = vmatprep.subr.bf16.mxu0 %v8613_v13 }
 0xb7a   :  { %8418 = vmatpush3.bf16.msra.mxu0 %v8417_v42 }
 0xb7b   :  { %7793 = vmatprep.subr.mxu0 %v8614_v23 }
 0xb7e   :  { %7794 = vmatpush3.msra.mxu0 %v5778_v3 }
 0xb7f   :  { %7796 = vmatmul.mubr.f32.vlgmr.msra.gmra.mrb[12].mxu0 %v5711_v11  ;;  %8419 = vmatprep.subr.bf16.mxu0 %v8613_v13 }
 0xb80   :  { %8421 = vmatpush3.bf16.msra.mxu0 %v9862_v39  ;;  %7816 = vmatprep.mubr.msk.f32.mxu0 %vm8615_vm1, %v8614_v23 }
 0xb81   :  { %8422 = vmatprep.subr.bf16.mxu0 %v8613_v13 }
 0xb84   :  { %8424 = vmatpush3.bf16.msra.mxu0 %v9888_v9 }
 0xb85   :  { %8425 = vmatprep.subr.bf16.mxu0 %v8613_v13 }
 0xb88   :  { %8427 = vmatpush3.bf16.msra.mxu0 %v9901_v16 }
 0xb89   :  { %8428 = vmatprep.subr.bf16.mxu0 %v8613_v13 }
 0xb8c   :  { %8430 = vmatpush3.bf16.msra.mxu0 %v9907_v28 }
 0xb8d   :  { %7814 = vmatprep.subr.mxu0 %v8614_v23 }
 0xb90   :  { %7815 = vmatpush3.msra.mxu0 %v9916_v30 }
 0xb91   :  { %7817 = vmatmul.mubr.f32.vlgmr.msra.gmra.mrb[12].mxu0 %v5712_v4  ;;  %8431 = vmatprep.subr.bf16.mxu0 %v8613_v13 }
 0xb92   :  { %8433 = vmatpush3.bf16.msra.mxu0 %v8432_v21  ;;  %7837 = vmatprep.mubr.msk.f32.mxu0 %vm8615_vm1, %v8614_v23 }
 0xb93   :  { %8434 = vmatprep.subr.bf16.mxu0 %v8613_v13 }
 0xb96   :  { %8436 = vmatpush3.bf16.msra.mxu0 %v8435_v57 }
 0xb97   :  { %8437 = vmatprep.subr.bf16.mxu0 %v8613_v13 }
 0xb9a   :  { %8439 = vmatpush3.bf16.msra.mxu0 %v8438_v58 }
 0xb9b   :  { %8440 = vmatprep.subr.bf16.mxu0 %v8613_v13 }
 0xb9e   :  { %8442 = vmatpush3.bf16.msra.mxu0 %v8441_v61 }
 0xb9f   :  { %7835 = vmatprep.subr.mxu0 %v8614_v23 }
 0xba2   :  { %7836 = vmatpush3.msra.mxu0 %v5779_v34 }
 0xba3   :  { %7838 = vmatmul.mubr.f32.vlgmr.msra.gmra.mrb[12].mxu0 %v9946_v35  ;;  %8443 = vmatprep.subr.bf16.mxu0 %v8613_v13 }
 0xba4   :  { %8445 = vmatpush3.bf16.msra.mxu0 %v9862_v39  ;;  %7858 = vmatprep.mubr.msk.f32.mxu0 %vm8615_vm1, %v8614_v23 }
 0xba5   :  { %8446 = vmatprep.subr.bf16.mxu0 %v8613_v13 }
 0xba8   :  { %8448 = vmatpush3.bf16.msra.mxu0 %v9888_v9 }
 0xba9   :  { %8449 = vmatprep.subr.bf16.mxu0 %v8613_v13 }
 0xbac   :  { %8451 = vmatpush3.bf16.msra.mxu0 %v9901_v16 }
 0xbad   :  { %8452 = vmatprep.subr.bf16.mxu0 %v8613_v13 }
 0xbb0   :  { %8454 = vmatpush3.bf16.msra.mxu0 %v9907_v28 }
 0xbb1   :  { %7856 = vmatprep.subr.mxu0 %v8614_v23 }
 0xbb4   :  { %7857 = vmatpush3.msra.mxu0 %v9916_v30 }
 0xbb5   :  { %7859 = vmatmul.mubr.f32.vlgmr.msra.gmra.mrb[12].mxu0 %v9946_v35 }
 0xc88   :  { %v6182_v39 = vpop.f32.mrb[12].mxu0 }
 0xc89   :  { %6186 = vst.msk [vmem:[#allocation3] sm:$0xff] %vm1660_vm8, %v6182_v39  ;;  %v7860_v9 = vpop.f32.mrb[13].mxu0 }
 0xc8a   :  { %8599 = shalt.err (!%p8596_p4)
}
 0xc8b   :  { %s8600_s3 = scalar_lea.hbm %s10012_s2, 128 }
 0xc8c   :  { %p8601_p5 = scmp.ne.s32.totalorder %s10012_s2, %s8600_s3  ;;  %p8604_p6 = scmp.lt.u32.totalorder %s8600_s3, %s10012_s2 }
 0xc8e   :  { %p8606_p7 = pnand %p8604_p6, %p8601_p5 }
 0xc90   :  { %8609 = shalt.err (!%p8606_p7)
}
 0xc91   :  { %6196 = dma.vmem_to_hbm [thread:$0]  %s6194_s27, 128, %s10012_s2, [#allocation4]  }
 0xc92   :  { %8610 = dma.done.wait [#allocation4], 128  }
 0xc93   :  { %8611 = vsyncadd [#allocation4], 4294967168 }
 0xc94   :  { %6200 = vsyncpa [#allocation4], 1 }

</bundles_post_ra>
